<compile_context>
chip_gen: v5e
topology: v5e:2x2
jax: 0.10.0
libtpu: 0.0.40
codegen_flags: <defaults>
</compile_context>

<pallas_src>
import functools
import math

import jax
import jax.numpy as jnp
import numpy as np
from jax.experimental import pallas as pl
from jax.experimental.pallas import tpu as pltpu


def _attention_head_kernel(feat_ref, pt_ref, w_ref, out_ref, z_acc):
    # feat_ref : (Cc, S_in)     f32   one C-chunk of one batch row (NCHW slab)
    # pt_ref   : (S_in, S_out)  bf16  adaptive-avg-pool matrix (transposed)
    # w_ref    : (2*Np, Cc)     bf16  [W_last ; W_att] stacked, this C-chunk
    # out_ref  : (Np, 1)        f32   per-class attention-weighted logits (bias-free)
    # z_acc    : (2*Np, S_out)  f32   accumulator across C-chunks
    k = pl.program_id(1)

    @pl.when(k == 0)
    def _():
        z_acc[...] = jnp.zeros_like(z_acc)

    # Stage 1: adaptive average pooling of this C-chunk as one MXU matmul.
    # The f32 -> bf16 cast happens here (no separate XLA pass over features).
    pooled = jnp.dot(feat_ref[...].astype(jnp.bfloat16), pt_ref[...],
                     preferred_element_type=jnp.float32)          # (Cc, S_out)

    # Stage 2: both 1x1 convs in one fused MXU pass, accumulated over C-chunks.
    z_acc[...] += jnp.dot(w_ref[...], pooled.astype(jnp.bfloat16),
                          preferred_element_type=jnp.float32)     # (2Np, S_out)

    @pl.when(k == pl.num_programs(1) - 1)
    def _():
        Np = out_ref.shape[0]
        z = z_acc[...]
        logits = z[:Np, :]           # (Np, S_out)
        logit_att = z[Np:, :]        # (Np, S_out)
        # Softmax over the spatial (lane) axis, normalization fused into the
        # weighted spatial sum.  b_att cancels exactly (constant along the
        # softmax axis); b_last is added in the wrapper.  Padded class rows
        # have zero weights -> num=0, den=S_out -> output 0 (no NaNs).
        m = jnp.max(logit_att, axis=1, keepdims=True)
        e = jnp.exp(logit_att - m)
        num = jnp.sum(logits * e, axis=1, keepdims=True)          # (Np, 1)
        den = jnp.sum(e, axis=1, keepdims=True)                   # (Np, 1)
        out_ref[...] = num * pl.reciprocal(den, approx=True)


@functools.lru_cache(maxsize=None)
def _adaptive_pool_matrix(H, W, A):
    """(A*A, H*W) matrix reproducing nn.AdaptiveAvgPool2d bin averaging."""
    P = np.zeros((A * A, H * W), np.float32)
    for i in range(A):
        h0 = (i * H) // A
        h1 = -((-(i + 1) * H) // A)          # ceil((i+1)*H/A)
        for j in range(A):
            w0 = (j * W) // A
            w1 = -((-(j + 1) * W) // A)
            cnt = (h1 - h0) * (w1 - w0)
            for h in range(h0, h1):
                for w in range(w0, w1):
                    P[i * A + j, h * W + w] = 1.0 / cnt
    return P


def init_attention_head_params(w_last, w_att, H, W, attention_size):
    """Precompute weight-like constants ONCE (amortized across forward calls)."""
    N, C = w_last.shape
    A = attention_size
    # Class dim sits on sublanes (M of the stage-2 matmul), so pad to 32, not 128.
    Np = 32 * pl.cdiv(N, 32)
    pt = jnp.asarray(_adaptive_pool_matrix(H, W, A).T, jnp.bfloat16)   # (S_in, S_out)
    wcat = np.zeros((2 * Np, C), np.float32)
    wcat[:N, :] = np.asarray(w_last, np.float32)
    wcat[Np:Np + N, :] = np.asarray(w_att, np.float32)
    wcat = jnp.asarray(wcat, jnp.bfloat16)                             # (2*Np, C)
    return pt, wcat


@functools.partial(jax.jit, static_argnames=("num_classes", "c_chunk"))
def attention_head_apply(features_nchw, pt, wcat, b_last, *,
                         num_classes, c_chunk=512):
    B, C, H, W = features_nchw.shape
    N = num_classes
    Np = wcat.shape[0] // 2
    S_in = H * W
    S_out = pt.shape[1]
    if C % c_chunk != 0:
        c_chunk = C
    n_k = C // c_chunk

    # NCHW -> (B, C, S_in) is a free reshape; features stay f32 (cast in-kernel).
    feat = features_nchw.reshape(B, C, S_in)

    out = pl.pallas_call(
        _attention_head_kernel,
        out_shape=jax.ShapeDtypeStruct((B, Np, 1), jnp.float32),
        grid_spec=pltpu.PrefetchScalarGridSpec(
            num_scalar_prefetch=0,
            grid=(B, n_k),                                  # reduction axis last
            in_specs=[
                pl.BlockSpec((None, c_chunk, S_in), lambda b, k: (b, k, 0)),   # features (f32)
                pl.BlockSpec((S_in, S_out), lambda b, k: (0, 0)),              # pool matrix^T
                pl.BlockSpec((2 * Np, c_chunk), lambda b, k: (0, k)),          # fused weights
            ],
            out_specs=pl.BlockSpec((None, Np, 1), lambda b, k: (b, 0, 0)),
            scratch_shapes=[pltpu.VMEM((2 * Np, S_out), jnp.float32)],
        ),
        compiler_params=pltpu.CompilerParams(
            dimension_semantics=("parallel", "arbitrary")),
    )(feat, pt, wcat)

    # b_last commutes with the attention-weighted sum (attention weights sum to 1).
    return out[:, :N, 0] + b_last[None, :]


def reference(features, wl, bl, wa, ba, A):
    """Plain-JAX (f32) mirror of the PyTorch forward (biases included)."""
    B, C, H, W = features.shape
    P = jnp.asarray(_adaptive_pool_matrix(H, W, A))                  # (A*A, H*W)
    feat = features.reshape(B, C, H * W)
    pooled = jnp.einsum('bcs,ps->bcp', feat, P)                      # (B, C, A*A)
    logits = jnp.einsum('nc,bcp->bnp', wl, pooled) + bl[None, :, None]
    la = jnp.einsum('nc,bcp->bnp', wa, pooled) + ba[None, :, None]
    att = jax.nn.softmax(la, axis=2)
    return (logits * att).sum(2)


if __name__ == "__main__":
    B, C, H, W = 2, 2048, 16, 16            # backbone feature map (NCHW)
    num_classes, attention_size = 19, 8

    key = jax.random.PRNGKey(0)
    kf, k1, k2, k3, k4 = jax.random.split(key, 5)
    features = jax.random.normal(kf, (B, C, H, W), jnp.float32)

    # deterministic init matching nn.Conv2d defaults (uniform(+-1/sqrt(fan_in)))
    bound = 1.0 / math.sqrt(C)
    w_last = jax.random.uniform(k1, (num_classes, C), jnp.float32, -bound, bound)
    b_last = jax.random.uniform(k2, (num_classes,), jnp.float32, -bound, bound)
    w_att = jax.random.uniform(k3, (num_classes, C), jnp.float32, -bound, bound)
    b_att = jax.random.uniform(k4, (num_classes,), jnp.float32, -bound, bound)

    # Precompute weight-like constants once (b_att is dropped: it has no
    # mathematical effect through the softmax).
    pt, wcat = init_attention_head_params(w_last, w_att, H, W, attention_size)

    out = attention_head_apply(features, pt, wcat, b_last,
                               num_classes=num_classes)
    out = jax.block_until_ready(out)
    assert out.shape == (B, num_classes)

    ref = reference(features, w_last, b_last, w_att, b_att, attention_size)
    np.testing.assert_allclose(np.asarray(out), np.asarray(ref),
                               rtol=2e-2, atol=2e-2)
    print("KERNEL_OK")
</pallas_src>

<mosaic_0001>
module attributes {stable_mosaic.version = 11 : i64} {
  func.func @_attention_head_kernel(%arg0: i32, %arg1: i32, %arg2: memref<1x512x256xf32, #tpu.memory_space<vmem>>, %arg3: memref<256x64xbf16, #tpu.memory_space<vmem>>, %arg4: memref<64x512xbf16, #tpu.memory_space<vmem>>, %arg5: memref<1x32x1xf32, #tpu.memory_space<vmem>>, %arg6: memref<64x64xf32, #tpu.memory_space<vmem>>) attributes {dimension_semantics = [#tpu.dimension_semantics<parallel>, #tpu.dimension_semantics<arbitrary>], iteration_bounds = array<i64: 2, 4>, scalar_prefetch = 0 : i64, scratch_operands = 1 : i64, tpu.core_type = #tpu.core_type<tc>, window_params = [{transform_indices = @transform_0, window_bounds = array<i64: 1, 512, 256>}, {pipeline_mode = #tpu.pipeline_mode<synchronous>, transform_indices = @transform_1, window_bounds = array<i64: 256, 64>}, {transform_indices = @transform_2, window_bounds = array<i64: 64, 512>}, {transform_indices = @transform_3, window_bounds = array<i64: 1, 32, 1>}]} {
    %c0_i32 = arith.constant 0 : i32
    %0 = arith.cmpi eq, %arg1, %c0_i32 : i32
    %1 = arith.extui %0 : i1 to i32
    %c0_i32_0 = arith.constant 0 : i32
    %2 = arith.cmpi ne, %1, %c0_i32_0 : i32
    scf.if %2 {
      %cst_13 = arith.constant 0.000000e+00 : f32
      %17 = vector.broadcast %cst_13 : f32 to vector<64x64xf32>
      %c0_14 = arith.constant 0 : index
      %c0_15 = arith.constant 0 : index
      %18 = vector.load %arg6[%c0_14, %c0_15] : memref<64x64xf32, #tpu.memory_space<vmem>>, vector<64x64xf32>
      tpu.vector_store %arg6[%c0_14, %c0_15], %17 {strides = array<i32>} : memref<64x64xf32, #tpu.memory_space<vmem>>, vector<64x64xf32>,
    } else {
    }
    %c0 = arith.constant 0 : index
    %c0_1 = arith.constant 0 : index
    %c0_2 = arith.constant 0 : index
    %3 = vector.load %arg2[%c0, %c0_1, %c0_2] : memref<1x512x256xf32, #tpu.memory_space<vmem>>, vector<1x512x256xf32>
    %4 = vector.shape_cast %3 : vector<1x512x256xf32> to vector<512x256xf32>
    %5 = arith.truncf %4 : vector<512x256xf32> to vector<512x256xbf16>
    %c0_3 = arith.constant 0 : index
    %c0_4 = arith.constant 0 : index
    %6 = vector.load %arg3[%c0_3, %c0_4] : memref<256x64xbf16, #tpu.memory_space<vmem>>, vector<256x64xbf16>
    %cst = arith.constant dense<0.000000e+00> : vector<512x64xf32>
    %7 = tpu.matmul %5, %6, %cst {dimension_numbers = #tpu.dot_dimension_numbers<[1], [0], [0], [1], [0, 0, 1, 1], [], []>} : vector<512x256xbf16>, vector<256x64xbf16>, vector<512x64xf32> -> vector<512x64xf32>
    %c0_5 = arith.constant 0 : index
    %c0_6 = arith.constant 0 : index
    %8 = vector.load %arg6[%c0_5, %c0_6] : memref<64x64xf32, #tpu.memory_space<vmem>>, vector<64x64xf32>
    %c0_7 = arith.constant 0 : index
    %c0_8 = arith.constant 0 : index
    %9 = vector.load %arg4[%c0_7, %c0_8] : memref<64x512xbf16, #tpu.memory_space<vmem>>, vector<64x512xbf16>
    %10 = arith.truncf %7 : vector<512x64xf32> to vector<512x64xbf16>
    %cst_9 = arith.constant dense<0.000000e+00> : vector<64x64xf32>
    %11 = tpu.matmul %9, %10, %cst_9 {dimension_numbers = #tpu.dot_dimension_numbers<[1], [0], [0], [1], [0, 0, 1, 1], [], []>} : vector<64x512xbf16>, vector<512x64xbf16>, vector<64x64xf32> -> vector<64x64xf32>
    %12 = arith.addf %8, %11 : vector<64x64xf32>
    %c0_10 = arith.constant 0 : index
    %c0_11 = arith.constant 0 : index
    %13 = vector.load %arg6[%c0_10, %c0_11] : memref<64x64xf32, #tpu.memory_space<vmem>>, vector<64x64xf32>
    tpu.vector_store %arg6[%c0_10, %c0_11], %12 {strides = array<i32>} : memref<64x64xf32, #tpu.memory_space<vmem>>, vector<64x64xf32>,
    %c3_i32 = arith.constant 3 : i32
    %14 = arith.cmpi eq, %arg1, %c3_i32 : i32
    %15 = arith.extui %14 : i1 to i32
    %c0_i32_12 = arith.constant 0 : i32
    %16 = arith.cmpi ne, %15, %c0_i32_12 : i32
    scf.if %16 {
      %c0_13 = arith.constant 0 : index
      %c0_14 = arith.constant 0 : index
      %17 = vector.load %arg6[%c0_13, %c0_14] : memref<64x64xf32, #tpu.memory_space<vmem>>, vector<64x64xf32>
      %18 = vector.extract_strided_slice %17 {offsets = [0, 0], sizes = [32, 64], strides = [1, 1]} : vector<64x64xf32> to vector<32x64xf32>
      %19 = vector.extract_strided_slice %17 {offsets = [32, 0], sizes = [32, 64], strides = [1, 1]} : vector<64x64xf32> to vector<32x64xf32>
      %cst_15 = arith.constant dense<0xFF800000> : vector<32xf32>
      %20 = vector.multi_reduction <maximumf>, %19, %cst_15 [1] : vector<32x64xf32> to vector<32xf32>
      %21 = vector.shape_cast %20 : vector<32xf32> to vector<32x1xf32>
      %22 = vector.broadcast %21 : vector<32x1xf32> to vector<32x64xf32>
      %23 = arith.subf %19, %22 : vector<32x64xf32>
      %24 = math.exp %23 : vector<32x64xf32>
      %25 = arith.mulf %18, %24 : vector<32x64xf32>
      %cst_16 = arith.constant dense<0.000000e+00> : vector<32xf32>
      %26 = vector.multi_reduction <add>, %25, %cst_16 [1] : vector<32x64xf32> to vector<32xf32>
      %27 = vector.shape_cast %26 : vector<32xf32> to vector<32x1xf32>
      %cst_17 = arith.constant dense<0.000000e+00> : vector<32xf32>
      %28 = vector.multi_reduction <add>, %24, %cst_17 [1] : vector<32x64xf32> to vector<32xf32>
      %29 = vector.shape_cast %28 : vector<32xf32> to vector<32x1xf32>
      %30 = tpu.reciprocal %29 {approx = true} : vector<32x1xf32> -> vector<32x1xf32>
      %31 = arith.mulf %27, %30 : vector<32x1xf32>
      %c0_18 = arith.constant 0 : index
      %c0_19 = arith.constant 0 : index
      %c0_20 = arith.constant 0 : index
      %32 = vector.load %arg5[%c0_18, %c0_19, %c0_20] : memref<1x32x1xf32, #tpu.memory_space<vmem>>, vector<1x32x1xf32>
      %33 = vector.shape_cast %32 : vector<1x32x1xf32> to vector<32x1xf32>
      %34 = vector.shape_cast %31 : vector<32x1xf32> to vector<1x32x1xf32>
      tpu.vector_store %arg5[%c0_18, %c0_19, %c0_20], %34 {strides = array<i32>} : memref<1x32x1xf32, #tpu.memory_space<vmem>>, vector<1x32x1xf32>,
    } else {
    }
    return
  }
  func.func @transform_0(%arg0: i32, %arg1: i32) -> (i32, i32, i32) {
    %c0_i32 = arith.constant 0 : i32
    %c0_i32_0 = arith.constant 0 : i32
    return %arg0, %arg1, %c0_i32 : i32, i32, i32
  }
  func.func @transform_1(%arg0: i32, %arg1: i32) -> (i32, i32) {
    %c0_i32 = arith.constant 0 : i32
    %c0_i32_0 = arith.constant 0 : i32
    %c0_i32_1 = arith.constant 0 : i32
    return %c0_i32, %c0_i32_0 : i32, i32
  }
  func.func @transform_2(%arg0: i32, %arg1: i32) -> (i32, i32) {
    %c0_i32 = arith.constant 0 : i32
    %c0_i32_0 = arith.constant 0 : i32
    return %c0_i32, %arg1 : i32, i32
  }
  func.func @transform_3(%arg0: i32, %arg1: i32) -> (i32, i32, i32) {
    %c0_i32 = arith.constant 0 : i32
    %c0_i32_0 = arith.constant 0 : i32
    %c0_i32_1 = arith.constant 0 : i32
    return %arg0, %c0_i32, %c0_i32_0 : i32, i32, i32
  }
}

</mosaic_0001>

<bundles_post_ra>
// kernel: attention_head_apply.1
= control target key start
LH: loop header
LB: loop body
LE: loop exit
PB: predicated region body
PF: predicated region fallthrough
CT: control target
= control target key end

     0   :  { %s1730_s12 = smov 0   ;;  %s1732_s13 = smov 0   ;;  %s2270_s0 = inlined_call_operand.vmem [shape: f32[2,2048,256], index: 0, kind: input, shape index: {}]   ;;  %s2271_s1 = inlined_call_operand.vmem [shape: bf16[256,64], index: 1, kind: input, shape index: {}]   ;;  %s2272_s2 = inlined_call_operand.vmem [shape: bf16[64,2048], index: 2, kind: input, shape index: {}]   ;;  %s2273_s3 = inlined_call_operand.vmem [shape: f32[2,32,1], index: 3, kind: output, shape index: {}]  }
   0x1   :  { %s1734_s14 = smov 0   ;;  %s1736_s15 = smov 0  }
   0x2   :  { %s1738_s16 = smov 0   ;;  %s1740_s17 = smov 0  }
   0x3   :  { %s1742_s18 = smov 0  }
   0x4 LB: > { %s22_s19 = sadd.s32 1, %s1699_s16  ;;  %s25_s20 = sadd.s32 1, %s1703_s17  ;;  %s1707_s18 = sphi %s1742_s18, %s13_s18   ;;  %s1703_s17 = sphi %s1740_s17, %s2279_s17   ;;  %s1699_s16 = sphi %s1738_s16, %s2278_s16   ;;  %s1695_s15 = sphi %s1736_s15, %s2277_s15   ;;  %s1691_s14 = sphi %s1734_s14, %s2276_s14   ;;  %s1687_s13 = sphi %s1732_s13, %s2275_s13   ;;  %s1683_s12 = sphi %s1730_s12, %s2274_s12  }
   0x5   : > { %p23_p0 = scmp.ge.s32.totalorder %s22_s19, 4  ;;  %s81_s21 = sadd.s32 1, %s1687_s13 }
   0x6   : > { %p88_p1 = scmp.ne.s32.totalorder %s1687_s13, %s1683_s12  ;;  %p89_p2 = scmp.eq.s32.totalorder %s1707_s18, 0 }
   0x7   : > { %s2281_s19 = smov (%p23_p0, %s22_s19), 0  ;;  %s2283_s20 = smov (!%p23_p0, %s25_s20), %s1703_s17 }
   0x8   : > { %s78_s22 = ssub.s32 %s1699_s16, %s2281_s19  ;;  %p90_p3 = por %p89_p2, %p88_p1 }
   0x9   : > { %p27_p4 = scmp.ge.s32.totalorder %s2283_s20, 2  ;;  %p79_p5 = scmp.eq.s32.totalorder %s78_s22, 0 }
   0xa   : > { %p1386_p6 = scmp.ge.s32.totalorder %s1707_s18, 8 }
   0xb   : > { %s2285_s20 = smov (%p27_p4, %s2283_s20), 0 }
   0xc   : > { %s1779_s23 = scalar_select %p79_p5, %s1687_s13, %s81_s21  }
   0xd   : > { %143 = sbr.rel (%p1386_p6) target bundleno = 38 (0x26), region = 20 }
  0x12   : > { %160 = sbr.rel (!%p90_p3) target bundleno = 38 (0x26), region = 28  ;;  %s162_s24 = sand.u32 (%p90_p3), 1, %s1687_s13  }
  0x13   : > { %s1530_s25 = sshll.u32 (%p90_p3), %s1699_s16, 4  ;;  %s1387_s26 = sshll.u32 (%p90_p3), %s162_s24, 7 }
  0x14   : > { %s1787_s29 = scalar_lea.vmem (%p90_p3), %s2272_s2, %s1530_s25  ;;  %s164_s30 = scalar_lea.vmem (%p90_p3), [#allocation3], %s1387_s26 }
  0x15   : > { %v180_v0 = vld [vmem:[%s1787_s29] sm:$0xff] (%p90_p3)  ;;  %v182_v1 = vld [vmem:[%s1787_s29 + $0x8] sm:$0xff] (%p90_p3) }
  0x16   : > { %v184_v2 = vld [vmem:[%s1787_s29 + $0x40] sm:$0xff] (%p90_p3)  ;;  %181 = vst [vmem:[%s164_s30] sm:$0xff] (%p90_p3), %v180_v0  ;;  %v186_v3 = vld [vmem:[%s1787_s29 + $0x48] sm:$0xff] (%p90_p3) }
  0x17   : > { %183 = vst [vmem:[%s164_s30 + $0x8] sm:$0xff] %v182_v1  ;;  %v188_v4 = vld [vmem:[%s1787_s29 + $0x80] sm:$0xff]  ;;  %v190_v5 = vld [vmem:[%s1787_s29 + $0x88] sm:$0xff] }
  0x18   : > { %185 = vst [vmem:[%s164_s30 + $0x10] sm:$0xff] %v184_v2  ;;  %v192_v6 = vld [vmem:[%s1787_s29 + $0xc0] sm:$0xff]  ;;  %v194_v7 = vld [vmem:[%s1787_s29 + $0xc8] sm:$0xff] }
  0x19   : > { %187 = vst [vmem:[%s164_s30 + $0x18] sm:$0xff] %v186_v3  ;;  %v196_v8 = vld [vmem:[%s1787_s29 + $0x100] sm:$0xff]  ;;  %v198_v9 = vld [vmem:[%s1787_s29 + $0x108] sm:$0xff] }
  0x1a   : > { %189 = vst [vmem:[%s164_s30 + $0x20] sm:$0xff] %v188_v4  ;;  %v200_v10 = vld [vmem:[%s1787_s29 + $0x140] sm:$0xff]  ;;  %v202_v11 = vld [vmem:[%s1787_s29 + $0x148] sm:$0xff] }
  0x1b   : > { %191 = vst [vmem:[%s164_s30 + $0x28] sm:$0xff] %v190_v5  ;;  %v204_v12 = vld [vmem:[%s1787_s29 + $0x180] sm:$0xff]  ;;  %v206_v13 = vld [vmem:[%s1787_s29 + $0x188] sm:$0xff] }
  0x1c   : > { %193 = vst [vmem:[%s164_s30 + $0x30] sm:$0xff] %v192_v6  ;;  %v208_v14 = vld [vmem:[%s1787_s29 + $0x1c0] sm:$0xff]  ;;  %v210_v15 = vld [vmem:[%s1787_s29 + $0x1c8] sm:$0xff] }
  0x1d   : > { %195 = vst [vmem:[%s164_s30 + $0x38] sm:$0xff] %v194_v7 }
  0x1e   : > { %197 = vst [vmem:[%s164_s30 + $0x40] sm:$0xff] %v196_v8 }
  0x1f   : > { %199 = vst [vmem:[%s164_s30 + $0x48] sm:$0xff] %v198_v9 }
  0x20   : > { %201 = vst [vmem:[%s164_s30 + $0x50] sm:$0xff] %v200_v10 }
  0x21   : > { %203 = vst [vmem:[%s164_s30 + $0x58] sm:$0xff] %v202_v11 }
  0x22   : > { %205 = vst [vmem:[%s164_s30 + $0x60] sm:$0xff] %v204_v12 }
  0x23   : > { %207 = vst [vmem:[%s164_s30 + $0x68] sm:$0xff] %v206_v13 }
  0x24   : > { %209 = vst [vmem:[%s164_s30 + $0x70] sm:$0xff] %v208_v14 }
  0x25   : > { %211 = vst [vmem:[%s164_s30 + $0x78] sm:$0xff] %v210_v15 }
  0x26 PF: > { %p1390_p7 = scmp.ge.s32.totalorder %s1707_s18, 1  ;;  %p216_p8 = scmp.lt.s32.totalorder %s1707_s18, 9 }
  0x28   : > { %p217_p9 = pnand %p1390_p7, %p216_p8 }
  0x29   : > { %s223_s4 = sand.u32 (!%p217_p9), 1, %s1683_s12   ;;  %s1392_s5 = sshll.u32 (!%p217_p9), %s1691_s14, 6 }
  0x2a   : > { %220 = sbr.rel (%p217_p9) target bundleno = 1037 (0x40d), region = 51  ;;  %s1391_s6 = sshll.u32 (!%p217_p9), %s223_s4, 7 }
  0x2b   : > { %p257_p10 = scmp.lt.s32.totalorder (!%p217_p9), %s1695_s15, 1  ;;  %p259_p11 = scmp.lt.s32.totalorder (!%p217_p9), %s1392_s5, 255 }
  0x2c   : > { %s1821_s27 = scalar_lea.vmem (!%p217_p9), [#allocation3], %s1391_s6  ;;  %p1398_p12 = scmp.ne.s32.totalorder (!%p217_p9), %s1691_s14, 0 }
  0x2f   : > { %s2287_s15 = smov (!%p257_p10, %s1695_s15), 1  ;;  %s2289_s5 = smov (!%p259_p11, %s1392_s5), 255 }
  0x30   : > { %s1394_s7 = sshll.u32 %s2287_s15, 9  ;;  %s1531_s8 = sshll.u32 %s2287_s15, 5 }
  0x31   : > { %s1393_s9 = sshll.u32 %s2289_s5, 1  ;;  %s1814_s21 = scalar_lea.vmem %s2273_s3, %s1531_s8 }
  0x32   : > { %s263_s22 = sadd.s32 %s1394_s7, %s1393_s9  ;;  %276 = sbr.rel (%p1398_p12) target bundleno = 64 (0x40), region = 59 }
  0x33   : > { %s1395_s24 = sshll.u32 %s263_s22, 3 }
  0x34   : > { %s1819_s12 = scalar_lea.vmem %s2270_s0, %s1395_s24 }
  0x37   : > { %vm277_vm0 = vcmask 523264   ;;  %v1709_v16 = vmov 0.0  }
  0x38   : > { %278 = vst.msk [vmem:[#allocation2] sm:$0xff] %vm277_vm0, %v1709_v16 }
  0x39   : > { %279 = vst.msk [vmem:[#allocation2 + $0x8] sm:$0xff] %vm277_vm0, %v1709_v16 }
  0x3a   : > { %280 = vst.msk [vmem:[#allocation2 + $0x10] sm:$0xff] %vm277_vm0, %v1709_v16 }
  0x3b   : > { %281 = vst.msk [vmem:[#allocation2 + $0x18] sm:$0xff] %vm277_vm0, %v1709_v16 }
  0x3c   : > { %282 = vst.msk [vmem:[#allocation2 + $0x20] sm:$0xff] %vm277_vm0, %v1709_v16 }
  0x3d   : > { %283 = vst.msk [vmem:[#allocation2 + $0x28] sm:$0xff] %vm277_vm0, %v1709_v16 }
  0x3e   : > { %284 = vst.msk [vmem:[#allocation2 + $0x30] sm:$0xff] %vm277_vm0, %v1709_v16 }
  0x3f   : > { %285 = vst.msk [vmem:[#allocation2 + $0x38] sm:$0xff] %vm277_vm0, %v1709_v16 }
  0x40 PF: > { %v1539_v17 = vld [vmem:[%s2271_s1 + $0x38] sm:$0xff]  ;;  %v1538_v19 = vld [vmem:[%s2271_s1 + $0x30] sm:$0xff]  ;;  %v1537_v21 = vld [vmem:[%s2271_s1 + $0x28] sm:$0xff]  ;;  %vm1204_vm1 = vcmask 523264   ;;  %p1527_p13 = scmp.ne.s32.totalorder %s1691_s14, 3 }
  0x41   : > { %v1547_v18 = vld [vmem:[%s2271_s1 + $0x78] sm:$0xff]  ;;  %606 = vmatpush.bf16.msra.mxu0 %v1539_v17  ;;  %v1546_v20 = vld [vmem:[%s2271_s1 + $0x70] sm:$0xff]  ;;  %1564 = vmatpush.bf16.msra.mxu2 %v1539_v17  ;;  %v1545_v22 = vld [vmem:[%s2271_s1 + $0x68] sm:$0xff] }
  0x42   : > { %775 = vmatpush.bf16.msra.mxu1 %v1547_v18  ;;  %1572 = vmatpush.bf16.msra.mxu3 %v1547_v18  ;;  %v1536_v23 = vld [vmem:[%s2271_s1 + $0x20] sm:$0xff]  ;;  %v1535_v25 = vld [vmem:[%s2271_s1 + $0x18] sm:$0xff]  ;;  %v1534_v27 = vld [vmem:[%s2271_s1 + $0x10] sm:$0xff] }
  0x43   : > { %v1544_v24 = vld [vmem:[%s2271_s1 + $0x60] sm:$0xff]  ;;  %v1543_v26 = vld [vmem:[%s2271_s1 + $0x58] sm:$0xff]  ;;  %v1542_v28 = vld [vmem:[%s2271_s1 + $0x50] sm:$0xff] }
  0x44   : > { %v1533_v29 = vld [vmem:[%s2271_s1 + $0x8] sm:$0xff]  ;;  %v1532_v31 = vld [vmem:[%s2271_s1] sm:$0xff]  ;;  %v288_v34 = vld [vmem:[%s1819_s12 + $0x10] sm:$0xff] }
  0x45   : > { %607 = vmatpush.bf16.msra.mxu0 %v1538_v19  ;;  %1565 = vmatpush.bf16.msra.mxu2 %v1538_v19  ;;  %v1541_v30 = vld [vmem:[%s2271_s1 + $0x48] sm:$0xff]  ;;  %v1540_v32 = vld [vmem:[%s2271_s1 + $0x40] sm:$0xff]  ;;  %v289_v36 = vld [vmem:[%s1819_s12 + $0x18] sm:$0xff] }
  0x46   : > { %776 = vmatpush.bf16.msra.mxu1 %v1546_v20  ;;  %1573 = vmatpush.bf16.msra.mxu3 %v1546_v20  ;;  %v286_v33 = vld [vmem:[%s1819_s12] sm:$0xff]  ;;  %v287_v35 = vld [vmem:[%s1819_s12 + $0x8] sm:$0xff]  ;;  %v292_v40 = vld [vmem:[%s1819_s12 + $0x30] sm:$0xff] }
  0x47   : > { %v414_v37 = vpack.c.bf16 %v288_v34, %v286_v33  ;;  %v415_v38 = vpack.c.bf16 %v289_v36, %v287_v35  ;;  %v290_v39 = vld [vmem:[%s1819_s12 + $0x20] sm:$0xff]  ;;  %v291_v41 = vld [vmem:[%s1819_s12 + $0x28] sm:$0xff]  ;;  %v293_v42 = vld [vmem:[%s1819_s12 + $0x38] sm:$0xff] }
  0x48   : > { %v416_v43 = vpack.c.bf16 %v292_v40, %v290_v39  ;;  %v417_v44 = vpack.c.bf16 %v293_v42, %v291_v41  ;;  %v294_v45 = vld [vmem:[%s1819_s12 + $0x40] sm:$0xff]  ;;  %v296_v46 = vld [vmem:[%s1819_s12 + $0x50] sm:$0xff]  ;;  %v295_v47 = vld [vmem:[%s1819_s12 + $0x48] sm:$0xff] }
  0x49   : > { %608 = vmatpush.bf16.msra.mxu0 %v1537_v21  ;;  %1566 = vmatpush.bf16.msra.mxu2 %v1537_v21  ;;  %v297_v48 = vld [vmem:[%s1819_s12 + $0x58] sm:$0xff]  ;;  %v418_v49 = vpack.c.bf16 %v296_v46, %v294_v45  ;;  %v298_v51 = vld [vmem:[%s1819_s12 + $0x60] sm:$0xff]  ;;  %v300_v52 = vld [vmem:[%s1819_s12 + $0x70] sm:$0xff] }
  0x4a   : > { %777 = vmatpush.bf16.msra.mxu1 %v1545_v22  ;;  %1574 = vmatpush.bf16.msra.mxu3 %v1545_v22  ;;  %v419_v50 = vpack.c.bf16 %v297_v48, %v295_v47  ;;  %v299_v53 = vld [vmem:[%s1819_s12 + $0x68] sm:$0xff]  ;;  %v301_v54 = vld [vmem:[%s1819_s12 + $0x78] sm:$0xff]  ;;  %v420_v55 = vpack.c.bf16 %v300_v52, %v298_v51  ;;  %v366_v57 = vld [vmem:[%s1819_s12 + $0x280] sm:$0xff] }
  0x4b   : > { %v421_v56 = vpack.c.bf16 %v301_v54, %v299_v53  ;;  %v368_v58 = vld [vmem:[%s1819_s12 + $0x290] sm:$0xff]  ;;  %v367_v59 = vld [vmem:[%s1819_s12 + $0x288] sm:$0xff]  ;;  %v369_v61 = vld [vmem:[%s1819_s12 + $0x298] sm:$0xff] }
  0x4c   : > { %v454_v60 = vpack.c.bf16 %v368_v58, %v366_v57  ;;  %v455_v62 = vpack.c.bf16 %v369_v61, %v367_v59  ;;  %v302_v63 = vld [vmem:[%s1819_s12 + $0x80] sm:$0xff]  ;;  %v304_v0 = vld [vmem:[%s1819_s12 + $0x90] sm:$0xff]  ;;  %v303_v1 = vld [vmem:[%s1819_s12 + $0x88] sm:$0xff] }
  0x4d   : > { %609 = vmatpush.bf16.msra.mxu0 %v1536_v23  ;;  %1567 = vmatpush.bf16.msra.mxu2 %v1536_v23  ;;  %v305_v2 = vld [vmem:[%s1819_s12 + $0x98] sm:$0xff]  ;;  %v422_v3 = vpack.c.bf16 %v304_v0, %v302_v63  ;;  %v370_v5 = vld [vmem:[%s1819_s12 + $0x2a0] sm:$0xff]  ;;  %v372_v6 = vld [vmem:[%s1819_s12 + $0x2b0] sm:$0xff] }
  0x4e   : > { %778 = vmatpush.bf16.msra.mxu1 %v1544_v24  ;;  %1575 = vmatpush.bf16.msra.mxu3 %v1544_v24  ;;  %v423_v4 = vpack.c.bf16 %v305_v2, %v303_v1  ;;  %v371_v7 = vld [vmem:[%s1819_s12 + $0x2a8] sm:$0xff]  ;;  %v456_v8 = vpack.c.bf16 %v372_v6, %v370_v5  ;;  %v373_v9 = vld [vmem:[%s1819_s12 + $0x2b8] sm:$0xff]  ;;  %v306_v11 = vld [vmem:[%s1819_s12 + $0xa0] sm:$0xff] }
  0x4f   : > { %v457_v10 = vpack.c.bf16 %v373_v9, %v371_v7  ;;  %v308_v12 = vld [vmem:[%s1819_s12 + $0xb0] sm:$0xff]  ;;  %v307_v13 = vld [vmem:[%s1819_s12 + $0xa8] sm:$0xff]  ;;  %v309_v14 = vld [vmem:[%s1819_s12 + $0xb8] sm:$0xff] }
  0x50   : > { %v424_v15 = vpack.c.bf16 %v308_v12, %v306_v11  ;;  %v425_v16 = vpack.c.bf16 %v309_v14, %v307_v13  ;;  %v374_v17 = vld [vmem:[%s1819_s12 + $0x2c0] sm:$0xff]  ;;  %v376_v18 = vld [vmem:[%s1819_s12 + $0x2d0] sm:$0xff]  ;;  %v375_v19 = vld [vmem:[%s1819_s12 + $0x2c8] sm:$0xff] }
  0x51   : > { %610 = vmatpush.bf16.msra.mxu0 %v1535_v25  ;;  %1568 = vmatpush.bf16.msra.mxu2 %v1535_v25  ;;  %v458_v20 = vpack.c.bf16 %v376_v18, %v374_v17  ;;  %v377_v21 = vld [vmem:[%s1819_s12 + $0x2d8] sm:$0xff]  ;;  %v310_v23 = vld [vmem:[%s1819_s12 + $0xc0] sm:$0xff]  ;;  %v312_v24 = vld [vmem:[%s1819_s12 + $0xd0] sm:$0xff] }
  0x52   : > { %779 = vmatpush.bf16.msra.mxu1 %v1543_v26  ;;  %1576 = vmatpush.bf16.msra.mxu3 %v1543_v26  ;;  %v459_v22 = vpack.c.bf16 %v377_v21, %v375_v19  ;;  %v311_v25 = vld [vmem:[%s1819_s12 + $0xc8] sm:$0xff]  ;;  %v313_v26 = vld [vmem:[%s1819_s12 + $0xd8] sm:$0xff]  ;;  %v314_v35 = vld [vmem:[%s1819_s12 + $0xe0] sm:$0xff] }
  0x53   : > { %v381_v33 = vld [vmem:[%s1819_s12 + $0x2f8] sm:$0xff]  ;;  %v316_v36 = vld [vmem:[%s1819_s12 + $0xf0] sm:$0xff]  ;;  %v382_v41 = vld [vmem:[%s1819_s12 + $0x300] sm:$0xff] }
  0x54   : > { %v428_v39 = vpack.c.bf16 %v316_v36, %v314_v35  ;;  %v384_v42 = vld [vmem:[%s1819_s12 + $0x310] sm:$0xff]  ;;  %v385_v45 = vld [vmem:[%s1819_s12 + $0x318] sm:$0xff]  ;;  %v318_v47 = vld [vmem:[%s1819_s12 + $0x100] sm:$0xff] }
  0x55   : > { %611 = vmatpush.bf16.msra.mxu0 %v1534_v27  ;;  %1569 = vmatpush.bf16.msra.mxu2 %v1534_v27  ;;  %v426_v27 = vpack.c.bf16 %v312_v24, %v310_v23  ;;  %v320_v48 = vld [vmem:[%s1819_s12 + $0x110] sm:$0xff]  ;;  %v387_v58 = vld [vmem:[%s1819_s12 + $0x328] sm:$0xff]  ;;  %v322_v1 = vld [vmem:[%s1819_s12 + $0x120] sm:$0xff] }
  0x56   : > { %780 = vmatpush.bf16.msra.mxu1 %v1542_v28  ;;  %1577 = vmatpush.bf16.msra.mxu3 %v1542_v28  ;;  %v427_v28 = vpack.c.bf16 %v313_v26, %v311_v25  ;;  %v430_v51 = vpack.c.bf16 %v320_v48, %v318_v47  ;;  %v388_v57 = vld [vmem:[%s1819_s12 + $0x330] sm:$0xff]  ;;  %v325_v5 = vld [vmem:[%s1819_s12 + $0x138] sm:$0xff]  ;;  %v390_v11 = vld [vmem:[%s1819_s12 + $0x340] sm:$0xff] }
  0x57   : > { %v392_v12 = vld [vmem:[%s1819_s12 + $0x350] sm:$0xff]  ;;  %v391_v13 = vld [vmem:[%s1819_s12 + $0x348] sm:$0xff]  ;;  %v393_v17 = vld [vmem:[%s1819_s12 + $0x358] sm:$0xff] }
  0x58   : > { %v467_v19 = vpack.c.bf16 %v393_v17, %v391_v13  ;;  %v327_v23 = vld [vmem:[%s1819_s12 + $0x148] sm:$0xff]  ;;  %v329_v24 = vld [vmem:[%s1819_s12 + $0x158] sm:$0xff]  ;;  %v404_v13 = vld [vmem:[%s1819_s12 + $0x3b0] sm:$0xff] }
  0x59   : > { %612 = vmatpush.bf16.msra.mxu0 %v1533_v29  ;;  %1570 = vmatpush.bf16.msra.mxu2 %v1533_v29  ;;  %v378_v29 = vld [vmem:[%s1819_s12 + $0x2e0] sm:$0xff]  ;;  %v435_v26 = vpack.c.bf16 %v329_v24, %v327_v23  ;;  %v397_v36 = vld [vmem:[%s1819_s12 + $0x378] sm:$0xff]  ;;  %v340_v24 = vld [vmem:[%s1819_s12 + $0x1b0] sm:$0xff] }
  0x5a   : > { %781 = vmatpush.bf16.msra.mxu1 %v1541_v30  ;;  %1578 = vmatpush.bf16.msra.mxu3 %v1541_v30  ;;  %v380_v30 = vld [vmem:[%s1819_s12 + $0x2f0] sm:$0xff]  ;;  %v338_v23 = vld [vmem:[%s1819_s12 + $0x1a0] sm:$0xff] }
  0x5d   : > { %613 = vmatpush.bf16.msra.mxu0 %v1532_v31  ;;  %1571 = vmatpush.bf16.msra.mxu2 %v1532_v31  ;;  %v379_v31 = vld [vmem:[%s1819_s12 + $0x2e8] sm:$0xff] }
  0x5e   : > { %782 = vmatpush.bf16.msra.mxu1 %v1540_v32  ;;  %1579 = vmatpush.bf16.msra.mxu3 %v1540_v32  ;;  %v460_v32 = vpack.c.bf16 %v380_v30, %v378_v29  ;;  %v461_v34 = vpack.c.bf16 %v381_v33, %v379_v31  ;;  %v394_v30 = vld [vmem:[%s1819_s12 + $0x360] sm:$0xff]  ;;  %v396_v31 = vld [vmem:[%s1819_s12 + $0x370] sm:$0xff] }
  0x5f   : > { %v468_v35 = vpack.c.bf16 %v396_v31, %v394_v30  ;;  %v440_v30 = vpack.c.bf16 %v340_v24, %v338_v23 }
  0x60   : > { %614 = vmatmul.bf16.vlgmr.msra.gmra.mxu0 %v414_v37  ;;  %714 = vmatmul.bf16.vlgmr.msra.gmra.mxu2 %v454_v60  ;;  %v315_v37 = vld [vmem:[%s1819_s12 + $0xe8] sm:$0xff] }
  0x61   : > { %783 = vmatmul.bf16.vlgmr.msra.gmra.mxu1 %v415_v38  ;;  %883 = vmatmul.bf16.vlgmr.msra.gmra.mxu3 %v455_v62  ;;  %v317_v38 = vld [vmem:[%s1819_s12 + $0xf8] sm:$0xff] }
  0x62   : > { %v429_v40 = vpack.c.bf16 %v317_v38, %v315_v37  ;;  %v389_v62 = vld [vmem:[%s1819_s12 + $0x338] sm:$0xff] }
  0x63   : > { %v465_v0 = vpack.c.bf16 %v389_v62, %v387_v58  ;;  %v335_v62 = vld [vmem:[%s1819_s12 + $0x188] sm:$0xff] }
  0x70   : > { %619 = vmatmul.bf16.gmra.mxu0 %v416_v43  ;;  %719 = vmatmul.bf16.gmra.mxu2 %v456_v8  ;;  %v383_v43 = vld [vmem:[%s1819_s12 + $0x308] sm:$0xff] }
  0x71   : > { %788 = vmatmul.bf16.gmra.mxu1 %v417_v44  ;;  %888 = vmatmul.bf16.gmra.mxu3 %v457_v10  ;;  %v462_v44 = vpack.c.bf16 %v384_v42, %v382_v41  ;;  %v463_v46 = vpack.c.bf16 %v385_v45, %v383_v43  ;;  %v332_v41 = vld [vmem:[%s1819_s12 + $0x170] sm:$0xff]  ;;  %v331_v42 = vld [vmem:[%s1819_s12 + $0x168] sm:$0xff]  ;;  %v333_v43 = vld [vmem:[%s1819_s12 + $0x178] sm:$0xff] }
  0x72   : > { %v437_v45 = vpack.c.bf16 %v333_v43, %v331_v42 }
  0x80   : > { %624 = vmatmul.bf16.gmra.mxu0 %v418_v49  ;;  %724 = vmatmul.bf16.gmra.mxu2 %v458_v20  ;;  %v319_v49 = vld [vmem:[%s1819_s12 + $0x108] sm:$0xff]  ;;  %v326_v20 = vld [vmem:[%s1819_s12 + $0x140] sm:$0xff] }
  0x81   : > { %793 = vmatmul.bf16.gmra.mxu1 %v419_v50  ;;  %893 = vmatmul.bf16.gmra.mxu3 %v459_v22  ;;  %v321_v50 = vld [vmem:[%s1819_s12 + $0x118] sm:$0xff]  ;;  %v328_v22 = vld [vmem:[%s1819_s12 + $0x150] sm:$0xff] }
  0x82   : > { %v431_v52 = vpack.c.bf16 %v321_v50, %v319_v49  ;;  %v434_v25 = vpack.c.bf16 %v328_v22, %v326_v20  ;;  %v398_v49 = vld [vmem:[%s1819_s12 + $0x380] sm:$0xff]  ;;  %v400_v50 = vld [vmem:[%s1819_s12 + $0x390] sm:$0xff] }
  0x90   : > { %629 = vmatmul.bf16.gmra.mxu0 %v420_v55  ;;  %729 = vmatmul.bf16.gmra.mxu2 %v460_v32  ;;  %v395_v32 = vld [vmem:[%s1819_s12 + $0x368] sm:$0xff] }
  0x91   : > { %798 = vmatmul.bf16.gmra.mxu1 %v421_v56  ;;  %898 = vmatmul.bf16.gmra.mxu3 %v461_v34  ;;  %v386_v56 = vld [vmem:[%s1819_s12 + $0x320] sm:$0xff]  ;;  %v469_v38 = vpack.c.bf16 %v397_v36, %v395_v32 }
  0x92   : > { %v464_v61 = vpack.c.bf16 %v388_v57, %v386_v56  ;;  %v401_v56 = vld [vmem:[%s1819_s12 + $0x398] sm:$0xff]  ;;  %v406_v36 = vld [vmem:[%s1819_s12 + $0x3c0] sm:$0xff] }
  0xa0   : > { %634 = vmatmul.bf16.gmra.mxu0 %v422_v3  ;;  %734 = vmatmul.bf16.gmra.mxu2 %v462_v44  ;;  %v324_v3 = vld [vmem:[%s1819_s12 + $0x130] sm:$0xff] }
  0xa1   : > { %803 = vmatmul.bf16.gmra.mxu1 %v423_v4  ;;  %903 = vmatmul.bf16.gmra.mxu3 %v463_v46  ;;  %v323_v4 = vld [vmem:[%s1819_s12 + $0x128] sm:$0xff]  ;;  %v432_v6 = vpack.c.bf16 %v324_v3, %v322_v1 }
  0xa2   : > { %v433_v7 = vpack.c.bf16 %v325_v5, %v323_v4 }
  0xb0   : > { %639 = vmatmul.bf16.gmra.mxu0 %v424_v15  ;;  %739 = vmatmul.bf16.gmra.mxu2 %v464_v61  ;;  %v336_v61 = vld [vmem:[%s1819_s12 + $0x190] sm:$0xff] }
  0xb1   : > { %808 = vmatmul.bf16.gmra.mxu1 %v425_v16  ;;  %908 = vmatmul.bf16.gmra.mxu3 %v465_v0  ;;  %v466_v16 = vpack.c.bf16 %v392_v12, %v390_v11  ;;  %v337_v0 = vld [vmem:[%s1819_s12 + $0x198] sm:$0xff]  ;;  %v402_v12 = vld [vmem:[%s1819_s12 + $0x3a0] sm:$0xff] }
  0xb2   : > { %v439_v5 = vpack.c.bf16 %v337_v0, %v335_v62  ;;  %v472_v17 = vpack.c.bf16 %v404_v13, %v402_v12  ;;  %v410_v62 = vld [vmem:[%s1819_s12 + $0x3e0] sm:$0xff]  ;;  %v412_v0 = vld [vmem:[%s1819_s12 + $0x3f0] sm:$0xff] }
  0xb3   : > { %v346_v12 = vld [vmem:[%s1819_s12 + $0x1e0] sm:$0xff]  ;;  %v348_v13 = vld [vmem:[%s1819_s12 + $0x1f0] sm:$0xff] }
  0xb4   : > { %v444_v23 = vpack.c.bf16 %v348_v13, %v346_v12 }
  0xc0   : > { %644 = vmatmul.bf16.gmra.mxu0 %v426_v27  ;;  %744 = vmatmul.bf16.gmra.mxu2 %v466_v16 }
  0xc1   : > { %813 = vmatmul.bf16.gmra.mxu1 %v427_v28  ;;  %913 = vmatmul.bf16.gmra.mxu3 %v467_v19  ;;  %v405_v19 = vld [vmem:[%s1819_s12 + $0x3b8] sm:$0xff] }
  0xd0   : > { %649 = vmatmul.bf16.gmra.mxu0 %v428_v39  ;;  %749 = vmatmul.bf16.gmra.mxu2 %v468_v35  ;;  %v330_v39 = vld [vmem:[%s1819_s12 + $0x160] sm:$0xff] }
  0xd1   : > { %818 = vmatmul.bf16.gmra.mxu1 %v429_v40  ;;  %918 = vmatmul.bf16.gmra.mxu3 %v469_v38  ;;  %v436_v44 = vpack.c.bf16 %v332_v41, %v330_v39  ;;  %v408_v38 = vld [vmem:[%s1819_s12 + $0x3d0] sm:$0xff]  ;;  %v407_v39 = vld [vmem:[%s1819_s12 + $0x3c8] sm:$0xff] }
  0xd2   : > { %v474_v43 = vpack.c.bf16 %v408_v38, %v406_v36 }
  0xdd   : > { %v615_v53 = vpop.f32.mrf.mxu0 }
  0xde   : > { %v784_v54 = vpop.f32.mrf.mxu1 }
  0xdf   : > { %v1928_v55 = vadd.f32 %v784_v54, %v615_v53  ;;  %v470_v54 = vpack.c.bf16 %v400_v50, %v398_v49  ;;  %v343_v49 = vld [vmem:[%s1819_s12 + $0x1c8] sm:$0xff]  ;;  %v345_v50 = vld [vmem:[%s1819_s12 + $0x1d8] sm:$0xff] }
  0xe0   : > { %654 = vmatmul.bf16.gmra.mxu0 %v430_v51  ;;  %v399_v51 = vld [vmem:[%s1819_s12 + $0x388] sm:$0xff] }
  0xe1   : > { %823 = vmatmul.bf16.gmra.mxu1 %v431_v52  ;;  %v471_v58 = vpack.c.bf16 %v401_v56, %v399_v51  ;;  %754 = vmatmul.bf16.gmra.mxu2 %v470_v54  ;;  %v443_v54 = vpack.c.bf16 %v345_v50, %v343_v49  ;;  %v351_v49 = vld [vmem:[%s1819_s12 + $0x208] sm:$0xff]  ;;  %v353_v50 = vld [vmem:[%s1819_s12 + $0x218] sm:$0xff] }
  0xe3   : > { %923 = vmatmul.bf16.gmra.mxu3 %v471_v58  ;;  %v715_v1 = vpop.f32.mrf.mxu2 }
  0xe4   : > { %v884_v3 = vpop.f32.mrf.mxu3 }
  0xe5   : > { %v617_v59 = vpop.f32.mrf.mxu0  ;;  %v1998_v20 = vadd.f32 %v884_v3, %v715_v1  ;;  %v411_v1 = vld [vmem:[%s1819_s12 + $0x3e8] sm:$0xff] }
  0xe6   : > { %v786_v60 = vpop.f32.mrf.mxu1 }
  0xe7   : > { %v1934_v63 = vadd.f32 %v786_v60, %v617_v59  ;;  %v334_v59 = vld [vmem:[%s1819_s12 + $0x180] sm:$0xff] }
  0xe8   : > { %v438_v4 = vpack.c.bf16 %v336_v61, %v334_v59 }
  0xe9   : > { %v968_v2 = vpack.c.bf16 %v1934_v63, %v1928_v55 }
  0xec   : > { %v1988_v11 = vpop.f32.mrf.mxu3 }
  0xed   : > { %v620_v8 = vpop.f32.mrf.mxu0 }
  0xee   : > { %v789_v9 = vpop.f32.mrf.mxu1 }
  0xef   : > { %v1942_v10 = vadd.f32 %v789_v9, %v620_v8  ;;  %v1986_v9 = vpop.f32.mrf.mxu2 }
  0xf0   : > { %659 = vmatmul.bf16.gmra.mxu0 %v432_v6 }
  0xf1   : > { %828 = vmatmul.bf16.gmra.mxu1 %v433_v7  ;;  %759 = vmatmul.bf16.gmra.mxu2 %v472_v17  ;;  %v349_v17 = vld [vmem:[%s1819_s12 + $0x1f8] sm:$0xff] }
  0xf5   : > { %v622_v14 = vpop.f32.mrf.mxu0 }
  0xf6   : > { %v791_v15 = vpop.f32.mrf.mxu1 }
  0xf7   : > { %v1948_v18 = vadd.f32 %v791_v15, %v622_v14  ;;  %v403_v14 = vld [vmem:[%s1819_s12 + $0x3a8] sm:$0xff] }
  0xf8   : > { %v473_v22 = vpack.c.bf16 %v405_v19, %v403_v14  ;;  %v347_v14 = vld [vmem:[%s1819_s12 + $0x1e8] sm:$0xff] }
  0xf9   : > { %v969_v21 = vpack.c.bf16 %v1948_v18, %v1942_v10  ;;  %v445_v24 = vpack.c.bf16 %v349_v17, %v347_v14 }
  0xfa   : > { %928 = vmatmul.bf16.gmra.mxu3 %v473_v22 }
  0xfd   : > { %v625_v27 = vpop.f32.mrf.mxu0 }
  0xfe   : > { %v794_v28 = vpop.f32.mrf.mxu1 }
  0xff   : > { %v1956_v29 = vadd.f32 %v794_v28, %v625_v27  ;;  %v2004_v27 = vpop.f32.mrf.mxu2  ;;  %v2006_v28 = vpop.f32.mrf.mxu3 }
 0x100   : > { %664 = vmatmul.bf16.gmra.mxu0 %v434_v25  ;;  %v339_v25 = vld [vmem:[%s1819_s12 + $0x1a8] sm:$0xff] }
 0x101   : > { %833 = vmatmul.bf16.gmra.mxu1 %v435_v26  ;;  %v341_v26 = vld [vmem:[%s1819_s12 + $0x1b8] sm:$0xff]  ;;  %764 = vmatmul.bf16.gmra.mxu2 %v474_v43 }
 0x102   : > { %v441_v31 = vpack.c.bf16 %v341_v26, %v339_v25 }
 0x105   : > { %v627_v33 = vpop.f32.mrf.mxu0 }
 0x106   : > { %v796_v34 = vpop.f32.mrf.mxu1 }
 0x107   : > { %v1962_v37 = vadd.f32 %v796_v34, %v627_v33  ;;  %v2012_v34 = vpop.f32.mrf.mxu2  ;;  %v2014_v35 = vpop.f32.mrf.mxu3 }
 0x109   : > { %v970_v40 = vpack.c.bf16 %v1962_v37, %v1956_v29 }
 0x10d   : > { %v630_v46 = vpop.f32.mrf.mxu0 }
 0x10e   : > { %v799_v47 = vpop.f32.mrf.mxu1 }
 0x10f   : > { %v1970_v48 = vadd.f32 %v799_v47, %v630_v46  ;;  %v342_v46 = vld [vmem:[%s1819_s12 + $0x1c0] sm:$0xff]  ;;  %v344_v47 = vld [vmem:[%s1819_s12 + $0x1d0] sm:$0xff]  ;;  %v2024_v51 = vpop.f32.mrf.mxu2 }
 0x110   : > { %669 = vmatmul.bf16.gmra.mxu0 %v436_v44  ;;  %v409_v44 = vld [vmem:[%s1819_s12 + $0x3d8] sm:$0xff] }
 0x111   : > { %838 = vmatmul.bf16.gmra.mxu1 %v437_v45  ;;  %v475_v45 = vpack.c.bf16 %v409_v44, %v407_v39 }
 0x113   : > { %933 = vmatmul.bf16.gmra.mxu3 %v475_v45 }
 0x115   : > { %v632_v52 = vpop.f32.mrf.mxu0 }
 0x116   : > { %v801_v53 = vpop.f32.mrf.mxu1 }
 0x117   : > { %v1976_v57 = vadd.f32 %v801_v53, %v632_v52  ;;  %v2026_v52 = vpop.f32.mrf.mxu3  ;;  %v442_v53 = vpack.c.bf16 %v344_v47, %v342_v46  ;;  %v2028_v59 = vpop.f32.mrf.mxu2  ;;  %v350_v46 = vld [vmem:[%s1819_s12 + $0x200] sm:$0xff]  ;;  %v352_v47 = vld [vmem:[%s1819_s12 + $0x210] sm:$0xff] }
 0x119   : > { %v971_v60 = vpack.c.bf16 %v1976_v57, %v1970_v48  ;;  %v895_v57 = vadd.f32 %v2026_v52, %v2024_v51  ;;  %v890_v52 = vadd.f32 %v2006_v28, %v2004_v27 }
 0x11d   : > { %v635_v6 = vpop.f32.mrf.mxu0 }
 0x11e   : > { %v804_v7 = vpop.f32.mrf.mxu1 }
 0x11f   : > { %v1984_v8 = vadd.f32 %v804_v7, %v635_v6  ;;  %v2030_v61 = vpop.f32.mrf.mxu3  ;;  %v413_v6 = vld [vmem:[%s1819_s12 + $0x3f8] sm:$0xff]  ;;  %v730_v19 = vpop.f32.mrf.mxu2 }
 0x120   : > { %674 = vmatmul.bf16.gmra.mxu0 %v438_v4  ;;  %v477_v7 = vpack.c.bf16 %v413_v6, %v411_v1  ;;  %v447_v6 = vpack.c.bf16 %v353_v50, %v351_v49  ;;  %v897_v29 = vadd.f32 %v2030_v61, %v2028_v59  ;;  %v892_v59 = vadd.f32 %v2014_v35, %v2012_v34  ;;  %v360_v61 = vld [vmem:[%s1819_s12 + $0x250] sm:$0xff] }
 0x121   : > { %843 = vmatmul.bf16.gmra.mxu1 %v439_v5  ;;  %v476_v5 = vpack.c.bf16 %v412_v0, %v410_v62  ;;  %v887_v49 = vadd.f32 %v1988_v11, %v1986_v9 }
 0x122   : > { %v990_v18 = vpack.c.bf16 %v897_v29, %v895_v57  ;;  %v989_v50 = vpack.c.bf16 %v892_v59, %v890_v52 }
 0x123   : > { %769 = vmatmul.bf16.gmra.mxu2 %v476_v5  ;;  %938 = vmatmul.bf16.gmra.mxu3 %v477_v7  ;;  %v446_v5 = vpack.c.bf16 %v352_v47, %v350_v46  ;;  %v988_v28 = vpack.c.bf16 %v887_v49, %v1998_v20 }
 0x125   : > { %v1993_v15 = vpop.f32.mrf.mxu0 }
 0x126   : > { %v1995_v16 = vpop.f32.mrf.mxu1 }
 0x127   : > { %v899_v22 = vpop.f32.mrf.mxu3 }
 0x12d   : > { %v2008_v32 = vpop.f32.mrf.mxu0 }
 0x12e   : > { %v2010_v33 = vpop.f32.mrf.mxu1 }
 0x12f   : > { %v810_v13 = vadd.f32 %v2010_v33, %v2008_v32 }
 0x130   : > { %679 = vmatmul.bf16.gmra.mxu0 %v440_v30  ;;  %v732_v30 = vpop.f32.mrf.mxu2 }
 0x131   : > { %848 = vmatmul.bf16.gmra.mxu1 %v441_v31  ;;  %v901_v31 = vpop.f32.mrf.mxu3 }
 0x132   : > { %v902_v46 = vadd.f32 %v901_v31, %v732_v30  ;;  %v359_v30 = vld [vmem:[%s1819_s12 + $0x248] sm:$0xff]  ;;  %v361_v31 = vld [vmem:[%s1819_s12 + $0x258] sm:$0xff] }
 0x133   : > { %v451_v47 = vpack.c.bf16 %v361_v31, %v359_v30 }
 0x135   : > { %v642_v41 = vpop.f32.mrf.mxu0 }
 0x136   : > { %v811_v42 = vpop.f32.mrf.mxu1 }
 0x137   : > { %v812_v0 = vadd.f32 %v811_v42, %v642_v41 }
 0x139   : > { %v904_v62 = vpop.f32.mrf.mxu3 }
 0x13d   : > { %v645_v56 = vpop.f32.mrf.mxu0 }
 0x13e   : > { %v814_v58 = vpop.f32.mrf.mxu1 }
 0x140   : > { %684 = vmatmul.bf16.gmra.mxu0 %v442_v53  ;;  %v815_v53 = vadd.f32 %v814_v58, %v645_v56  ;;  %v807_v56 = vadd.f32 %v1995_v16, %v1993_v15  ;;  %v973_v58 = vpack.c.bf16 %v812_v0, %v810_v13  ;;  %v354_v15 = vld [vmem:[%s1819_s12 + $0x220] sm:$0xff] }
 0x141   : > { %853 = vmatmul.bf16.gmra.mxu1 %v443_v54  ;;  %v735_v54 = vpop.f32.mrf.mxu2  ;;  %v2052_v42 = vpop.f32.mrf.mxu3 }
 0x142   : > { %v972_v32 = vpack.c.bf16 %v807_v56, %v1984_v8  ;;  %v2057_v17 = vadd.f32 %v904_v62, %v735_v54 }
 0x145   : > { %v647_v3 = vpop.f32.mrf.mxu0 }
 0x146   : > { %v816_v4 = vpop.f32.mrf.mxu1 }
 0x147   : > { %v817_v44 = vadd.f32 %v816_v4, %v647_v3 }
 0x149   : > { %v974_v1 = vpack.c.bf16 %v817_v44, %v815_v53  ;;  %v2050_v41 = vpop.f32.mrf.mxu2  ;;  %v909_v8 = vpop.f32.mrf.mxu3 }
 0x14d   : > { %v650_v25 = vpop.f32.mrf.mxu0 }
 0x14e   : > { %v819_v26 = vpop.f32.mrf.mxu1 }
 0x14f   : > { %v820_v39 = vadd.f32 %v819_v26, %v650_v25  ;;  %v357_v25 = vld [vmem:[%s1819_s12 + $0x238] sm:$0xff] }
 0x150   : > { %689 = vmatmul.bf16.gmra.mxu0 %v444_v23  ;;  %v356_v23 = vld [vmem:[%s1819_s12 + $0x230] sm:$0xff] }
 0x151   : > { %858 = vmatmul.bf16.gmra.mxu1 %v445_v24  ;;  %v355_v24 = vld [vmem:[%s1819_s12 + $0x228] sm:$0xff]  ;;  %v740_v26 = vpop.f32.mrf.mxu2 }
 0x152   : > { %v2089_v10 = vadd.f32 %v909_v8, %v740_v26 }
 0x155   : > { %v652_v36 = vpop.f32.mrf.mxu0 }
 0x156   : > { %v821_v38 = vpop.f32.mrf.mxu1 }
 0x157   : > { %v822_v43 = vadd.f32 %v821_v38, %v652_v36  ;;  %v448_v36 = vpack.c.bf16 %v356_v23, %v354_v15  ;;  %v449_v38 = vpack.c.bf16 %v357_v25, %v355_v24 }
 0x159   : > { %v975_v45 = vpack.c.bf16 %v822_v43, %v820_v39  ;;  %v2076_v48 = vpop.f32.mrf.mxu2 }
 0x15b   : > { %1080 = vmatpush.bf16.msrb.mxu2 %v975_v45  ;;  %v900_v45 = vadd.f32 %v899_v22, %v730_v19 }
 0x15d   : > { %v655_v7 = vpop.f32.mrf.mxu0  ;;  %v991_v37 = vpack.c.bf16 %v902_v46, %v900_v45 }
 0x15e   : > { %v824_v12 = vpop.f32.mrf.mxu1 }
 0x15f   : > { %v2046_v3 = vadd.f32 %v824_v12, %v655_v7  ;;  %1081 = vmatpush.bf16.msrb.mxu2 %v974_v1  ;;  %v362_v1 = vld [vmem:[%s1819_s12 + $0x260] sm:$0xff]  ;;  %v363_v7 = vld [vmem:[%s1819_s12 + $0x268] sm:$0xff]  ;;  %v365_v12 = vld [vmem:[%s1819_s12 + $0x278] sm:$0xff] }
 0x160   : > { %694 = vmatmul.bf16.gmra.mxu0 %v446_v5  ;;  %v453_v20 = vpack.c.bf16 %v365_v12, %v363_v7 }
 0x161   : > { %863 = vmatmul.bf16.gmra.mxu1 %v447_v6  ;;  %v745_v55 = vpop.f32.mrf.mxu2  ;;  %v364_v6 = vld [vmem:[%s1819_s12 + $0x270] sm:$0xff] }
 0x162   : > { %v452_v13 = vpack.c.bf16 %v364_v6, %v362_v1 }
 0x163   : > { %1082 = vmatpush.bf16.msrb.mxu2 %v973_v58 }
 0x165   : > { %v657_v33 = vpop.f32.mrf.mxu0 }
 0x166   : > { %v826_v4 = vpop.f32.mrf.mxu1 }
 0x167   : > { %v2055_v14 = vadd.f32 %v826_v4, %v657_v33  ;;  %1083 = vmatpush.bf16.msrb.mxu2 %v972_v32 }
 0x169   : > { %v976_v16 = vpack.c.bf16 %v2055_v14, %v2046_v3  ;;  %v2110_v11 = vpop.f32.mrf.mxu2 }
 0x16b   : > { %1084 = vmatpush.bf16.msrb.mxu2 %v971_v60 }
 0x16d   : > { %v660_v39 = vpop.f32.mrf.mxu0 }
 0x16e   : > { %v829_v43 = vpop.f32.mrf.mxu1 }
 0x16f   : > { %v2068_v44 = vadd.f32 %v829_v43, %v660_v39  ;;  %1085 = vmatpush.bf16.msrb.mxu2 %v970_v40  ;;  %v2082_v40 = vpop.f32.mrf.mxu3 }
 0x170   : > { %699 = vmatmul.bf16.gmra.mxu0 %v448_v36 }
 0x171   : > { %868 = vmatmul.bf16.gmra.mxu1 %v449_v38  ;;  %v750_v33 = vpop.f32.mrf.mxu2 }
 0x173   : > { %1086 = vmatpush.bf16.msrb.mxu2 %v969_v21  ;;  %v358_v21 = vld [vmem:[%s1819_s12 + $0x240] sm:$0xff] }
 0x175   : > { %v662_v60 = vpop.f32.mrf.mxu0 }
 0x176   : > { %v831_v19 = vpop.f32.mrf.mxu1 }
 0x177   : > { %v2084_v22 = vadd.f32 %v831_v19, %v662_v60  ;;  %1087 = vmatpush.bf16.msrb.mxu2 %v968_v2  ;;  %v914_v63 = vpop.f32.mrf.mxu3  ;;  %v450_v2 = vpack.c.bf16 %v360_v61, %v358_v21 }
 0x178   : > { %v2108_v9 = vadd.f32 %v914_v63, %v745_v55 }
 0x179   : > { %v977_v51 = vpack.c.bf16 %v2084_v22, %v2068_v44  ;;  %v2128_v8 = vpop.f32.mrf.mxu2 }
 0x17b   : > { %1138 = vmatpush.bf16.msra.mxu2 %v991_v37 }
 0x17d   : > { %v665_v53 = vpop.f32.mrf.mxu0 }
 0x17e   : > { %v834_v54 = vpop.f32.mrf.mxu1 }
 0x17f   : > { %1139 = vmatpush.bf16.msra.mxu2 %v990_v18  ;;  %v2103_v27 = vadd.f32 %v834_v54, %v665_v53  ;;  %v2112_v0 = vpop.f32.mrf.mxu3  ;;  %v1550_v53 = vld [vmem:[%s1821_s27 + $0xc] sm:$0xf0] }
 0x180   : > { %704 = vmatmul.bf16.gmra.mxu0 %v450_v2 }
 0x181   : > { %873 = vmatmul.bf16.gmra.mxu1 %v451_v47  ;;  %v755_v45 = vpop.f32.mrf.mxu2 }
 0x183   : > { %1140 = vmatpush.bf16.msra.mxu2 %v989_v50  ;;  %v1465_v50 = vld [vmem:[%s1821_s27] sm:$0xf] }
 0x184   : > { %v1466_v54 = vor.u32 %v1550_v53, %v1465_v50 }
 0x185   : > { %v667_v34 = vpop.f32.mrf.mxu0 }
 0x186   : > { %v836_v35 = vpop.f32.mrf.mxu1  ;;  %1088 = vmatmul.bf16.vlgmr.msrb.gmra.mxu2 %v1466_v54 }
 0x187   : > { %1141 = vmatpush.bf16.msra.mxu2 %v988_v28  ;;  %v2106_v62 = vadd.f32 %v836_v35, %v667_v34  ;;  %v919_v4 = vpop.f32.mrf.mxu3 }
 0x188   : > { %v2124_v25 = vadd.f32 %v919_v4, %v750_v33 }
 0x189   : > { %v978_v5 = vpack.c.bf16 %v2106_v62, %v2103_v27  ;;  %v2134_v18 = vpop.f32.mrf.mxu2  ;;  %v1513_v27 = vld [vmem:[%s1821_s27 + $0x60] sm:$0xf] }
 0x18d   : > { %v670_v56 = vpop.f32.mrf.mxu0 }
 0x18e   : > { %v839_v58 = vpop.f32.mrf.mxu1 }
 0x18f   : > { %v2120_v32 = vadd.f32 %v839_v58, %v670_v56  ;;  %v2130_v36 = vpop.f32.mrf.mxu3  ;;  %v1554_v56 = vld [vmem:[%s1821_s27 + $0x2c] sm:$0xf0] }
 0x190   : > { %709 = vmatmul.bf16.gmra.mxu0 %v452_v13 }
 0x191   : > { %878 = vmatmul.bf16.gmra.mxu1 %v453_v20  ;;  %v2138_v61 = vpop.f32.mrf.mxu2  ;;  %v1481_v20 = vld [vmem:[%s1821_s27 + $0x20] sm:$0xf] }
 0x195   : > { %v672_v15 = vpop.f32.mrf.mxu0 }
 0x196   : > { %v841_v23 = vpop.f32.mrf.mxu1 }
 0x197   : > { %v2122_v24 = vadd.f32 %v841_v23, %v672_v15  ;;  %v924_v46 = vpop.f32.mrf.mxu3  ;;  %v1482_v23 = vor.u32 %v1554_v56, %v1481_v20 }
 0x198   : > { %v2132_v37 = vadd.f32 %v924_v46, %v755_v45 }
 0x199   : > { %v979_v26 = vpack.c.bf16 %v2122_v24, %v2120_v32  ;;  %v2142_v63 = vpop.f32.mrf.mxu2  ;;  %1093 = vmatmul.bf16.gmra.mxu2 %v1482_v23  ;;  %v1548_v32 = vld [vmem:[%s1821_s27 + $0x4] sm:$0xf]  ;;  %v1467_v24 = vld [vmem:[%s1821_s27 + $0x10] sm:$0xf0]  ;;  %v912_v23 = vadd.f32 %v2082_v40, %v2076_v48 }
 0x19d   : > { %v675_v38 = vpop.f32.mrf.mxu0 }
 0x19e   : > { %v844_v39 = vpop.f32.mrf.mxu1 }
 0x19f   : > { %v845_v43 = vadd.f32 %v844_v39, %v675_v38  ;;  %v2136_v21 = vpop.f32.mrf.mxu3 }
 0x1a0   : > { %v927_v3 = vadd.f32 %v2136_v21, %v2134_v18 }
 0x1a1   : > { %v765_v35 = vpop.f32.mrf.mxu2 }
 0x1a5   : > { %v677_v57 = vpop.f32.mrf.mxu0 }
 0x1a6   : > { %v846_v29 = vpop.f32.mrf.mxu1 }
 0x1a7   : > { %v2140_v30 = vpop.f32.mrf.mxu3 }
 0x1a8   : > { %v930_v22 = vadd.f32 %v2140_v30, %v2138_v61  ;;  %v1483_v61 = vld [vmem:[%s1821_s27 + $0x30] sm:$0xf0]  ;;  %v917_v30 = vadd.f32 %v2112_v0, %v2110_v11  ;;  %v993_v11 = vpack.c.bf16 %v912_v23, %v2089_v10 }
 0x1a9   : > { %v767_v4 = vpop.f32.mrf.mxu2 }
 0x1ad   : > { %v680_v60 = vpop.f32.mrf.mxu0 }
 0x1ae   : > { %v849_v19 = vpop.f32.mrf.mxu1 }
 0x1af   : > { %v2144_v2 = vpop.f32.mrf.mxu3  ;;  %v850_v53 = vadd.f32 %v849_v19, %v680_v60 }
 0x1b5   : > { %v682_v52 = vpop.f32.mrf.mxu0 }
 0x1b6   : > { %v851_v59 = vpop.f32.mrf.mxu1 }
 0x1b7   : > { %v934_v1 = vpop.f32.mrf.mxu3  ;;  %v852_v39 = vadd.f32 %v851_v59, %v682_v52  ;;  %v1497_v52 = vld [vmem:[%s1821_s27 + $0x40] sm:$0xf]  ;;  %v1558_v59 = vld [vmem:[%s1821_s27 + $0x4c] sm:$0xf0] }
 0x1bd   : > { %v685_v31 = vpop.f32.mrf.mxu0 }
 0x1be   : > { %v854_v55 = vpop.f32.mrf.mxu1 }
 0x1bf   : > { %v936_v15 = vpop.f32.mrf.mxu3  ;;  %v855_v38 = vadd.f32 %v854_v55, %v685_v31  ;;  %v1498_v55 = vor.u32 %v1558_v59, %v1497_v52  ;;  %v1551_v52 = vld [vmem:[%s1821_s27 + $0x14] sm:$0xf0] }
 0x1c1   : > { %1098 = vmatmul.bf16.gmra.mxu2 %v1498_v55 }
 0x1c5   : > { %v687_v47 = vpop.f32.mrf.mxu0 }
 0x1c6   : > { %v856_v49 = vpop.f32.mrf.mxu1 }
 0x1c7   : > { %v857_v58 = vadd.f32 %v856_v49, %v687_v47  ;;  %v770_v47 = vpop.f32.mrf.mxu2  ;;  %v939_v49 = vpop.f32.mrf.mxu3 }
 0x1c8   : > { %v940_v19 = vadd.f32 %v939_v49, %v770_v47  ;;  %v1560_v47 = vld [vmem:[%s1821_s27 + $0x64] sm:$0xf]  ;;  %v1515_v49 = vld [vmem:[%s1821_s27 + $0x70] sm:$0xf0] }
 0x1c9   : > { %v982_v45 = vpack.c.bf16 %v857_v58, %v855_v38  ;;  %v1556_v38 = vld [vmem:[%s1821_s27 + $0x44] sm:$0xf]  ;;  %v1518_v55 = vor.u32 %v1560_v47, %v1515_v49 }
 0x1cd   : > { %v690_v28 = vpop.f32.mrf.mxu0 }
 0x1ce   : > { %v859_v34 = vpop.f32.mrf.mxu1 }
 0x1cf   : > { %v860_v12 = vadd.f32 %v859_v34, %v690_v28  ;;  %v847_v28 = vadd.f32 %v846_v29, %v677_v57  ;;  %v981_v34 = vpack.c.bf16 %v852_v39, %v850_v53  ;;  %v772_v57 = vpop.f32.mrf.mxu2  ;;  %v941_v29 = vpop.f32.mrf.mxu3  ;;  %v1499_v39 = vld [vmem:[%s1821_s27 + $0x50] sm:$0xf0] }
 0x1d5   : > { %v692_v6 = vpop.f32.mrf.mxu0 }
 0x1d6   : > { %v861_v7 = vpop.f32.mrf.mxu1 }
 0x1d7   : > { %v862_v13 = vadd.f32 %v861_v7, %v692_v6  ;;  %v980_v6 = vpack.c.bf16 %v847_v28, %v845_v43 }
 0x1d9   : > { %v983_v33 = vpack.c.bf16 %v862_v13, %v860_v12  ;;  %v942_v12 = vadd.f32 %v941_v29, %v772_v57  ;;  %v937_v13 = vadd.f32 %v936_v15, %v767_v4  ;;  %v996_v4 = vpack.c.bf16 %v927_v3, %v2132_v37  ;;  %v1552_v15 = vld [vmem:[%s1821_s27 + $0x24] sm:$0xf]  ;;  %v1549_v29 = vld [vmem:[%s1821_s27 + $0xc] sm:$0xf] }
 0x1db   : > { %1109 = vmatpush.bf16.msrb.mxu3 %v983_v33  ;;  %v999_v20 = vpack.c.bf16 %v942_v12, %v940_v19  ;;  %v1470_v33 = vor.u32 %v1548_v32, %v1467_v24  ;;  %v1491_v12 = vld [vmem:[%s1821_s27 + $0x38] sm:$0xf0]  ;;  %v1505_v32 = vld [vmem:[%s1821_s27 + $0x48] sm:$0xf]  ;;  %v1559_v24 = vld [vmem:[%s1821_s27 + $0x54] sm:$0xf0] }
 0x1dd   : > { %v695_v46 = vpop.f32.mrf.mxu0 }
 0x1de   : > { %v864_v50 = vpop.f32.mrf.mxu1 }
 0x1df   : > { %1110 = vmatpush.bf16.msrb.mxu3 %v982_v45  ;;  %v2150_v54 = vadd.f32 %v864_v50, %v695_v46 }
 0x1e3   : > { %1111 = vmatpush.bf16.msrb.mxu3 %v981_v34 }
 0x1e5   : > { %v2152_v7 = vpop.f32.mrf.mxu0 }
 0x1e6   : > { %v2154_v31 = vpop.f32.mrf.mxu1 }
 0x1e7   : > { %1112 = vmatpush.bf16.msrb.mxu3 %v980_v6  ;;  %v867_v28 = vadd.f32 %v2154_v31, %v2152_v7  ;;  %v1473_v6 = vld [vmem:[%s1821_s27 + $0x8] sm:$0xf]  ;;  %v1475_v7 = vld [vmem:[%s1821_s27 + $0x18] sm:$0xf0] }
 0x1e8   : > { %v1474_v57 = vor.u32 %v1551_v52, %v1473_v6  ;;  %v1489_v31 = vld [vmem:[%s1821_s27 + $0x28] sm:$0xf] }
 0x1e9   : > { %v984_v59 = vpack.c.bf16 %v867_v28, %v2150_v54  ;;  %v1553_v54 = vld [vmem:[%s1821_s27 + $0x2c] sm:$0xf]  ;;  %v946_v28 = vld [vmem:[#allocation2 + $0x10] sm:$0xff] }
 0x1eb   : > { %1113 = vmatpush.bf16.msrb.mxu3 %v979_v26  ;;  %v935_v26 = vadd.f32 %v934_v1, %v765_v35  ;;  %v922_v1 = vadd.f32 %v2130_v36, %v2128_v8  ;;  %v994_v8 = vpack.c.bf16 %v917_v30, %v2108_v9  ;;  %v907_v36 = vadd.f32 %v2052_v42, %v2050_v41 }
 0x1ec   : > { %v1502_v9 = vor.u32 %v1556_v38, %v1499_v39 }
 0x1ed   : > { %v2161_v60 = vpop.f32.mrf.mxu0  ;;  %v998_v62 = vpack.c.bf16 %v937_v13, %v935_v26  ;;  %v1494_v26 = vor.u32 %v1553_v54, %v1491_v12  ;;  %v1506_v13 = vor.u32 %v1559_v24, %v1505_v32 }
 0x1ee   : > { %v2163_v43 = vpop.f32.mrf.mxu1 }
 0x1ef   : > { %1114 = vmatpush.bf16.msrb.mxu3 %v978_v5  ;;  %v1562_v5 = vld [vmem:[%s1821_s27 + $0x6c] sm:$0xf0] }
 0x1f0   : > { %v1514_v44 = vor.u32 %v1562_v5, %v1513_v27 }
 0x1f2   : > { %1103 = vmatmul.bf16.gmra.mxu2 %v1514_v44  ;;  %v1561_v44 = vld [vmem:[%s1821_s27 + $0x6c] sm:$0xf] }
 0x1f3   : > { %1115 = vmatpush.bf16.msrb.mxu3 %v977_v51  ;;  %v932_v51 = vadd.f32 %v2144_v2, %v2142_v63  ;;  %v995_v63 = vpack.c.bf16 %v922_v1, %v2124_v25  ;;  %v1486_v2 = vor.u32 %v1552_v15, %v1483_v61  ;;  %v992_v25 = vpack.c.bf16 %v907_v36, %v2057_v17 }
 0x1f4   : > { %v870_v17 = vadd.f32 %v2163_v43, %v2161_v60  ;;  %v1555_v60 = vld [vmem:[%s1821_s27 + $0x34] sm:$0xf0]  ;;  %v1478_v43 = vor.u32 %v1549_v29, %v1475_v7 }
 0x1f5   : > { %v702_v56 = vpop.f32.mrf.mxu0  ;;  %v997_v14 = vpack.c.bf16 %v932_v51, %v930_v22  ;;  %v1490_v19 = vor.u32 %v1555_v60, %v1489_v31  ;;  %v1523_v22 = vld [vmem:[%s1821_s27 + $0x78] sm:$0xf0] }
 0x1f6   : > { %v871_v58 = vpop.f32.mrf.mxu1  ;;  %v1526_v51 = vor.u32 %v1561_v44, %v1523_v22 }
 0x1f7   : > { %1116 = vmatpush.bf16.msrb.mxu3 %v976_v16  ;;  %v872_v50 = vadd.f32 %v871_v58, %v702_v56  ;;  %v1507_v56 = vld [vmem:[%s1821_s27 + $0x58] sm:$0xf0]  ;;  %v1521_v58 = vld [vmem:[%s1821_s27 + $0x68] sm:$0xf] }
 0x1f9   : > { %v985_v34 = vpack.c.bf16 %v872_v50, %v870_v17 }
 0x1fa   : > { %1117 = vmatmul.bf16.vlgmr.msrb.gmra.mxu3 %v1470_v33  ;;  %v1563_v33 = vld [vmem:[%s1821_s27 + $0x74] sm:$0xf0] }
 0x1fb   : > { %1167 = vmatpush.bf16.msra.mxu3 %v999_v20  ;;  %v1557_v20 = vld [vmem:[%s1821_s27 + $0x4c] sm:$0xf] }
 0x1fc   : > { %v1510_v27 = vor.u32 %v1557_v20, %v1507_v56 }
 0x1fd   : > { %v705_v16 = vpop.f32.mrf.mxu0 }
 0x1fe   : > { %v874_v35 = vpop.f32.mrf.mxu1 }
 0x1ff   : > { %1168 = vmatpush.bf16.msra.mxu3 %v998_v62  ;;  %v875_v41 = vadd.f32 %v874_v35, %v705_v16  ;;  %v1522_v62 = vor.u32 %v1563_v33, %v1521_v58 }
 0x203   : > { %1169 = vmatpush.bf16.msra.mxu3 %v997_v14 }
 0x205   : > { %v707_v18 = vpop.f32.mrf.mxu0 }
 0x206   : > { %v876_v21 = vpop.f32.mrf.mxu1 }
 0x207   : > { %1170 = vmatpush.bf16.msra.mxu3 %v996_v4  ;;  %v877_v42 = vadd.f32 %v876_v21, %v707_v18 }
 0x209   : > { %v986_v53 = vpack.c.bf16 %v877_v42, %v875_v41  ;;  %v1089_v5 = vpop.f32.mrf.mxu2 }
 0x20a   : > { %1122 = vmatmul.bf16.gmra.mxu3 %v1486_v2 }
 0x20b   : > { %1171 = vmatpush.bf16.msra.mxu3 %v995_v63 }
 0x20d   : > { %v710_v0 = vpop.f32.mrf.mxu0 }
 0x20e   : > { %v879_v37 = vpop.f32.mrf.mxu1 }
 0x20f   : > { %1172 = vmatpush.bf16.msra.mxu3 %v994_v8  ;;  %v880_v45 = vadd.f32 %v879_v37, %v710_v0 }
 0x211   : > { %v1091_v3 = vpop.f32.mrf.mxu2 }
 0x213   : > { %1173 = vmatpush.bf16.msra.mxu3 %v993_v11 }
 0x215   : > { %v712_v48 = vpop.f32.mrf.mxu0 }
 0x216   : > { %v881_v40 = vpop.f32.mrf.mxu1 }
 0x217   : > { %1174 = vmatpush.bf16.msra.mxu3 %v992_v25  ;;  %v882_v46 = vadd.f32 %v881_v40, %v712_v48  ;;  %v944_v25 = vld [vmem:[#allocation2] sm:$0xff] }
 0x219   : > { %v987_v10 = vpack.c.bf16 %v882_v46, %v880_v45  ;;  %v945_v46 = vld [vmem:[#allocation2 + $0x8] sm:$0xff] }
 0x21a   : > { %1127 = vmatmul.bf16.gmra.mxu3 %v1502_v9 }
 0x21b   : > { %1142 = vmatpush.bf16.msra.mxu2 %v987_v10 }
 0x21c   : > { %v1094_v14 = vpop.f32.mrf.mxu2 }
 0x21f   : > { %1143 = vmatpush.bf16.msra.mxu2 %v986_v53 }
 0x223   : > { %1144 = vmatpush.bf16.msra.mxu2 %v985_v34 }
 0x224   : > { %v1096_v16 = vpop.f32.mrf.mxu2 }
 0x227   : > { %1145 = vmatpush.bf16.msra.mxu2 %v984_v59 }
 0x22a   : > { %1132 = vmatmul.bf16.gmra.mxu3 %v1518_v55  ;;  %1146 = vmatmul.bf16.vlgmr.msra.gmra.mxu2 %v1474_v57  ;;  %v947_v55 = vld [vmem:[#allocation2 + $0x18] sm:$0xff] }
 0x23a   : > { %1175 = vmatmul.bf16.vlgmr.msra.gmra.mxu3 %v1478_v43  ;;  %1151 = vmatmul.bf16.gmra.mxu2 %v1490_v19  ;;  %v948_v43 = vld [vmem:[#allocation2 + $0x20] sm:$0xff] }
 0x244   : > { %v1099_v4 = vpop.f32.mrf.mxu2 }
 0x24a   : > { %1180 = vmatmul.bf16.gmra.mxu3 %v1494_v26  ;;  %1156 = vmatmul.bf16.gmra.mxu2 %v1506_v13  ;;  %v949_v13 = vld [vmem:[#allocation2 + $0x28] sm:$0xff] }
 0x24c   : > { %v1101_v61 = vpop.f32.mrf.mxu2 }
 0x25a   : > { %1185 = vmatmul.bf16.gmra.mxu3 %v1510_v27  ;;  %1161 = vmatmul.bf16.gmra.mxu2 %v1522_v62 }
 0x26a   : > { %1190 = vmatmul.bf16.gmra.mxu3 %v1526_v51 }
 0x275   : > { %v1104_v63 = vpop.f32.mrf.mxu2 }
 0x27d   : > { %v1118_v35 = vpop.f32.mrf.mxu3  ;;  %v1106_v21 = vpop.f32.mrf.mxu2 }
 0x27e   : > { %v1119_v0 = vadd.f32 %v1118_v35, %v1089_v5  ;;  %v950_v5 = vld [vmem:[#allocation2 + $0x30] sm:$0xff]  ;;  %v951_v35 = vld [vmem:[#allocation2 + $0x38] sm:$0xff] }
 0x285   : > { %v1120_v1 = vpop.f32.mrf.mxu3 }
 0x286   : > { %v1121_v40 = vadd.f32 %v1120_v1, %v1091_v3 }
 0x28d   : > { %v1123_v15 = vpop.f32.mrf.mxu3 }
 0x28e   : > { %v1124_v50 = vadd.f32 %v1123_v15, %v1094_v14 }
 0x295   : > { %v1125_v30 = vpop.f32.mrf.mxu3 }
 0x296   : > { %v1126_v6 = vadd.f32 %v1125_v30, %v1096_v16 }
 0x29d   : > { %v1128_v18 = vpop.f32.mrf.mxu3 }
 0x29e   : > { %v1129_v31 = vadd.f32 %v1128_v18, %v1099_v4 }
 0x2a5   : > { %v1130_v2 = vpop.f32.mrf.mxu3 }
 0x2a6   : > { %v1131_v24 = vadd.f32 %v1130_v2, %v1101_v61 }
 0x2ad   : > { %v1133_v23 = vpop.f32.mrf.mxu3  ;;  %v1147_v8 = vpop.f32.mrf.mxu2 }
 0x2ae   : > { %v1148_v37 = vadd.f32 %v1147_v8, %v1119_v0  ;;  %v1134_v27 = vadd.f32 %v1133_v23, %v1104_v63 }
 0x2b5   : > { %v1135_v36 = vpop.f32.mrf.mxu3  ;;  %v1149_v11 = vpop.f32.mrf.mxu2 }
 0x2b6   : > { %v1150_v9 = vadd.f32 %v1149_v11, %v1121_v40  ;;  %v1136_v14 = vadd.f32 %v1135_v36, %v1106_v21 }
 0x2bd   : > { %v1176_v38 = vpop.f32.mrf.mxu3  ;;  %v1152_v45 = vpop.f32.mrf.mxu2 }
 0x2be   : > { %v1177_v39 = vadd.f32 %v1176_v38, %v1148_v37  ;;  %v1153_v53 = vadd.f32 %v1152_v45, %v1124_v50 }
 0x2c0   : > { %v1196_v48 = vadd.f32 %v1177_v39, %v944_v25 }
 0x2c2   : > { %1205 = vst.msk [vmem:[#allocation2] sm:$0xff] %vm1204_vm1, %v1196_v48 }
 0x2c5   : > { %v1178_v41 = vpop.f32.mrf.mxu3  ;;  %v1154_v17 = vpop.f32.mrf.mxu2 }
 0x2c6   : > { %v1179_v42 = vadd.f32 %v1178_v41, %v1150_v9  ;;  %v1155_v59 = vadd.f32 %v1154_v17, %v1126_v6 }
 0x2c8   : > { %v1197_v10 = vadd.f32 %v1179_v42, %v945_v46 }
 0x2ca   : > { %1206 = vst.msk [vmem:[#allocation2 + $0x8] sm:$0xff] %vm1204_vm1, %v1197_v10 }
 0x2cd   : > { %v1181_v34 = vpop.f32.mrf.mxu3  ;;  %v1157_v52 = vpop.f32.mrf.mxu2 }
 0x2ce   : > { %v1182_v47 = vadd.f32 %v1181_v34, %v1153_v53  ;;  %v1158_v60 = vadd.f32 %v1157_v52, %v1129_v31 }
 0x2d0   : > { %v1198_v49 = vadd.f32 %v1182_v47, %v946_v28 }
 0x2d2   : > { %1207 = vst.msk [vmem:[#allocation2 + $0x10] sm:$0xff] %vm1204_vm1, %v1198_v49 }
 0x2d5   : > { %v1183_v57 = vpop.f32.mrf.mxu3  ;;  %v1159_v54 = vpop.f32.mrf.mxu2 }
 0x2d6   : > { %v1184_v29 = vadd.f32 %v1183_v57, %v1155_v59  ;;  %v1160_v26 = vadd.f32 %v1159_v54, %v1131_v24 }
 0x2d8   : > { %v1199_v7 = vadd.f32 %v1184_v29, %v947_v55 }
 0x2da   : > { %1208 = vst.msk [vmem:[#allocation2 + $0x18] sm:$0xff] %vm1204_vm1, %v1199_v7 }
 0x2dd   : > { %v1186_v19 = vpop.f32.mrf.mxu3  ;;  %v1162_v58 = vpop.f32.mrf.mxu2 }
 0x2de   : > { %v1187_v12 = vadd.f32 %v1186_v19, %v1158_v60  ;;  %v1163_v62 = vadd.f32 %v1162_v58, %v1134_v27 }
 0x2e0   : > { %v1200_v32 = vadd.f32 %v1187_v12, %v948_v43 }
 0x2e2   : > { %1209 = vst.msk [vmem:[#allocation2 + $0x20] sm:$0xff] %vm1204_vm1, %v1200_v32 }
 0x2e5   : > { %v1188_v20 = vpop.f32.mrf.mxu3  ;;  %v1164_v3 = vpop.f32.mrf.mxu2 }
 0x2e6   : > { %v1189_v56 = vadd.f32 %v1188_v20, %v1160_v26  ;;  %v1165_v16 = vadd.f32 %v1164_v3, %v1136_v14 }
 0x2e8   : > { %v1201_v33 = vadd.f32 %v1189_v56, %v949_v13 }
 0x2ea   : > { %1210 = vst.msk [vmem:[#allocation2 + $0x28] sm:$0xff] %vm1204_vm1, %v1201_v33 }
 0x2ed   : > { %v1191_v44 = vpop.f32.mrf.mxu3 }
 0x2ee   : > { %v1192_v22 = vadd.f32 %v1191_v44, %v1163_v62 }
 0x2f0   : > { %v1202_v51 = vadd.f32 %v1192_v22, %v950_v5 }
 0x2f2   : > { %1211 = vst.msk [vmem:[#allocation2 + $0x30] sm:$0xff] %vm1204_vm1, %v1202_v51 }
 0x2f5   : > { %v1193_v1 = vpop.f32.mrf.mxu3 }
 0x2f6   : > { %v1194_v4 = vadd.f32 %v1193_v1, %v1165_v16  ;;  %1216 = sbr.rel (%p1527_p13) target bundleno = 1037 (0x40d), region = 63 }
 0x2f8   : > { %v1203_v15 = vadd.f32 %v1194_v4, %v951_v35 }
 0x2fa   : > { %1212 = vst.msk [vmem:[#allocation2 + $0x38] sm:$0xff] %vm1204_vm1, %v1203_v15 }
 0x2fb   : > { %v1223_v61 = vld [vmem:[#allocation2 + $0x30] sm:$0xff]  ;;  %v1221_v30 = vld [vmem:[#allocation2 + $0x20] sm:$0xff]  ;;  %v1222_v2 = vld [vmem:[#allocation2 + $0x28] sm:$0xff]  ;;  %vm1285_vm2 = vcmask 7168  }
 0x2fc   : > { %v1231_v63 = vsel %vm1204_vm1, %v1223_v61, -inf  ;;  %v1225_v18 = vsel %vm1204_vm1, %v1221_v30, -inf  ;;  %v1228_v8 = vsel %vm1204_vm1, %v1222_v2, -inf  ;;  %v1218_v50 = vld [vmem:[#allocation2 + $0x8] sm:$0xff]  ;;  %v1219_v6 = vld [vmem:[#allocation2 + $0x10] sm:$0xff]  ;;  %v1217_v52 = vld [vmem:[#allocation2] sm:$0xff] }
 0x2fd   : > { %1232 = vmax.xlane.f32.xlu1 %v1231_v63  ;;  %1226 = vmax.xlane.f32.xlu0 %v1225_v18  ;;  %v1220_v31 = vld [vmem:[#allocation2 + $0x18] sm:$0xff] }
 0x301   : > { %v1224_v21 = vld [vmem:[#allocation2 + $0x38] sm:$0xff] }
 0x302   : > { %v1234_v23 = vsel %vm1204_vm1, %v1224_v21, -inf }
 0x305   : > { %1235 = vmax.xlane.f32.xlu1 %v1234_v23  ;;  %1229 = vmax.xlane.f32.xlu0 %v1228_v8 }
 0x370   : > { %v1233_v36 = vpop.xlane.xlu1 %1232  ;;  %v1227_v11 = vpop.xlane.xlu0 %1226 }
 0x371   : > { %v1239_v0 = vsub.f32 %v1223_v61, %v1233_v36  ;;  %v1237_v37 = vsub.f32 %v1221_v30, %v1227_v11 }
 0x373   : > { %v1245_v25 = vmul.f32 1.442695, %v1239_v0  ;;  %v1241_v38 = vmul.f32 1.442695, %v1237_v37 }
 0x375   : > { %1637 = vpow2.f32 %v1245_v25 }
 0x376   : > { %1639 = vpow2.f32 %v1241_v38 }
 0x378   : > { %v1236_v39 = vpop.xlane.xlu1 %1235  ;;  %v1230_v45 = vpop.xlane.xlu0 %1229 }
 0x379   : > { %v1240_v48 = vsub.f32 %v1224_v21, %v1236_v39  ;;  %v1238_v40 = vsub.f32 %v1222_v2, %v1230_v45 }
 0x37b   : > { %v1638_v9 = vpop.eup %1637  ;;  %v1247_v46 = vmul.f32 1.442695, %v1240_v48  ;;  %v1243_v41 = vmul.f32 1.442695, %v1238_v40 }
 0x37c   : > { %v1640_v42 = vpop.eup %1639  ;;  %v1271_v10 = vsel %vm1204_vm1, %v1638_v9, 0.0  ;;  %v1251_v55 = vmul.f32 %v1638_v9, %v1219_v6 }
 0x37d   : > { %1641 = vpow2.f32 %v1247_v46  ;;  %v1265_v17 = vsel %vm1204_vm1, %v1640_v42, 0.0  ;;  %1272 = vadd.xlane.f32.xlu0 %v1271_v10  ;;  %v1249_v57 = vmul.f32 %v1640_v42, %v1217_v52 }
 0x37e   : > { %1643 = vpow2.f32 %v1243_v41  ;;  %1266 = vadd.xlane.f32.xlu2 %v1265_v17  ;;  %v1259_v29 = vsel %vm1204_vm1, %v1251_v55, 0.0 }
 0x37f   : > { %v1253_v7 = vsel %vm1204_vm1, %v1249_v57, 0.0 }
 0x383   : > { %v1642_v53 = vpop.eup %1641 }
 0x384   : > { %v1644_v28 = vpop.eup %1643  ;;  %v1274_v34 = vsel %vm1204_vm1, %v1642_v53, 0.0  ;;  %v1252_v60 = vmul.f32 %v1642_v53, %v1220_v31 }
 0x385   : > { %1275 = vadd.xlane.f32.xlu1 %v1274_v34  ;;  %v1268_v47 = vsel %vm1204_vm1, %v1644_v28, 0.0  ;;  %v1250_v49 = vmul.f32 %v1644_v28, %v1218_v50 }
 0x386   : > { %1269 = vadd.xlane.f32.xlu2 %v1268_v47  ;;  %v1262_v43 = vsel %vm1204_vm1, %v1252_v60, 0.0 }
 0x387   : > { %v1256_v59 = vsel %vm1204_vm1, %v1250_v49, 0.0 }
 0x388   : > { %1257 = vadd.xlane.f32.xlu0 %v1256_v59 }
 0x38d   : > { %1260 = vadd.xlane.f32.xlu1 %v1259_v29 }
 0x38e   : > { %1254 = vadd.xlane.f32.xlu2 %v1253_v7 }
 0x396   : > { %1263 = vadd.xlane.f32.xlu2 %v1262_v43 }
 0x3f0   : > { %v1273_v54 = vpop.xlane.xlu0 %1272 }
 0x3f1   : > { %v1267_v19 = vpop.xlane.xlu2 %1266  ;;  %1645 = vrcp.f32 %v1273_v54 }
 0x3f7   : > { %v1646_v24 = vpop.eup %1645 }
 0x3f8   : > { %v1276_v12 = vpop.xlane.xlu1 %1275 }
 0x3f9   : > { %v1270_v32 = vpop.xlane.xlu2 %1269 }
 0x3fa   : > { %1647 = vrcp.f32 %v1270_v32 }
 0x3fb   : > { %1649 = vrcp.f32 %v1267_v19  ;;  %v1258_v13 = vpop.xlane.xlu0 %1257 }
 0x3fc   : > { %1651 = vrcp.f32 %v1276_v12 }
 0x400   : > { %v1648_v26 = vpop.eup %1647  ;;  %v1261_v20 = vpop.xlane.xlu1 %1260 }
 0x401   : > { %v1650_v56 = vpop.eup %1649  ;;  %v1282_v58 = vmul.f32 %v1648_v26, %v1258_v13  ;;  %v1283_v33 = vmul.f32 %v1646_v24, %v1261_v20  ;;  %v1255_v27 = vpop.xlane.xlu2 %1254 }
 0x402   : > { %v1281_v62 = vmul.f32 %v1650_v56, %v1255_v27  ;;  %v1652_v5 = vpop.eup %1651 }
 0x403   : > { %1287 = vst.msk [vmem:[%s1814_s21 + $0x8] sm:$0xff] %vm1285_vm2, %v1282_v58 }
 0x404   : > { %1288 = vst.msk [vmem:[%s1814_s21 + $0x10] sm:$0xff] %vm1285_vm2, %v1283_v33 }
 0x405   : > { %1286 = vst.msk [vmem:[%s1814_s21] sm:$0xff] %vm1285_vm2, %v1281_v62 }
 0x409   : > { %v1264_v44 = vpop.xlane.xlu2 %1263 }
 0x40a   : > { %v1284_v22 = vmul.f32 %v1652_v5, %v1264_v44 }
 0x40c   : > { %1289 = vst.msk [vmem:[%s1814_s21 + $0x18] sm:$0xff] %vm1285_vm2, %v1284_v22 }
 0x40d PF: > { %s13_s18 = sadd.s32 1, %s1707_s18   ;;  %s2274_s12 = smov %s1687_s13 }
 0x40e   : > { %p10_p0 = scmp.ge.s32.totalorder %s13_s18, 10   ;;  %s2275_s13 = smov %s1779_s23 }
 0x40f   : > { %s2276_s14 = smov %s1699_s16  ;;  %s2277_s15 = smov %s1703_s17 }
 0x410   : > { %s2278_s16 = smov %s2281_s19  ;;  %s2279_s17 = smov %s2285_s20 }
 0x411   :  { %12 = sbr.rel (!%p10_p0) target bundleno = 4 (0x4), region = 101 }

</bundles_post_ra>
